<compile_context>
chip_gen: v5e
topology: v5e:2x2
jax: 0.10.0
libtpu: 0.0.40
codegen_flags: <defaults>
</compile_context>

<pallas_src>
import math
import jax
import jax.numpy as jnp
from jax.experimental import pallas as pl
from jax.experimental.pallas import tpu as pltpu

EPS = 1e-5


# ---------------------------------------------------------------------------
# Helpers
# ---------------------------------------------------------------------------
def _layernorm_f32(x_f32, w, b):
    mean = jnp.mean(x_f32, axis=-1, keepdims=True)
    xc = x_f32 - mean
    var = jnp.mean(xc * xc, axis=-1, keepdims=True)
    return xc * jax.lax.rsqrt(var + EPS) * w + b


def _round_up(n, m):
    return ((n + m - 1) // m) * m


def _pad_rows(a, mp):
    m = a.shape[0]
    return a if mp == m else jnp.pad(a, ((0, mp - m), (0, 0)))


# ---------------------------------------------------------------------------
# Kernel 1 (default fast path): fully fused block for the identity-Mixer case.
#   mix = 4 * LN_in(x); ff = fc2(relu(fc1(x))); out = LN_out(2*mix + ff)
# ---------------------------------------------------------------------------
def fused_block_kernel(x_ref, liw_ref, lib_ref, w1_ref, b1_ref, w2_ref, b2_ref,
                       low_ref, lob_ref, o_ref):
    # Small params read once (hoisted; no re-broadcast pressure in the body).
    liw = liw_ref[...]
    lib = lib_ref[...]
    b1 = b1_ref[...]
    b2 = b2_ref[...]
    low = low_ref[...]
    lob = lob_ref[...]

    x = x_ref[...]
    x32 = x.astype(jnp.float32)

    # Identity-Mixer collapse: cross_scan -> LN_in -> cross_merge == 4 * LN_in(x).
    mix = 4.0 * _layernorm_f32(x32, liw, lib)

    # PhiMLP: fc1 -> relu -> fc2.  bf16 operands feed the MXU, f32 accumulation.
    cdt = w1_ref.dtype
    h = jnp.dot(x.astype(cdt), w1_ref[...], preferred_element_type=jnp.float32) + b1
    h = jnp.maximum(h, 0.0)
    ff = jnp.dot(h.astype(cdt), w2_ref[...], preferred_element_type=jnp.float32) + b2

    # LN_out(mix + ff + mix)
    z = 2.0 * mix + ff
    o_ref[...] = _layernorm_f32(z, low, lob).astype(o_ref.dtype)


def fused_block_forward(x, params, *, tm=256):
    B, L, D = x.shape
    M = B * L
    Dff = params["w1"].shape[1]
    x2 = x.reshape(M, D)

    TM = min(tm, _round_up(M, 8))          # row tile, multiple of 8 sublanes
    Mp = _round_up(M, TM)
    x2p = _pad_rows(x2, Mp)

    w1, w2 = params["w1"], params["w2"]
    cost = pl.CostEstimate(
        flops=4 * Mp * D * Dff,                                  # two matmuls
        transcendentals=0,
        bytes_accessed=int(2 * Mp * D * x.dtype.itemsize
                           + D * Dff * (w1.dtype.itemsize + w2.dtype.itemsize)),
    )

    out = pl.pallas_call(
        fused_block_kernel,
        out_shape=jax.ShapeDtypeStruct((Mp, D), x.dtype),
        grid=(Mp // TM,),
        in_specs=[
            pl.BlockSpec((TM, D), lambda i: (i, 0)),      # x tile   (pipelined)
            pl.BlockSpec((1, D), lambda i: (0, 0)),       # ln_in w  (resident)
            pl.BlockSpec((1, D), lambda i: (0, 0)),       # ln_in b
            pl.BlockSpec((D, Dff), lambda i: (0, 0)),     # w1       (resident, bf16)
            pl.BlockSpec((1, Dff), lambda i: (0, 0)),     # b1
            pl.BlockSpec((Dff, D), lambda i: (0, 0)),     # w2       (resident, bf16)
            pl.BlockSpec((1, D), lambda i: (0, 0)),       # b2
            pl.BlockSpec((1, D), lambda i: (0, 0)),       # ln_out w
            pl.BlockSpec((1, D), lambda i: (0, 0)),       # ln_out b
        ],
        out_specs=pl.BlockSpec((TM, D), lambda i: (i, 0)),
        compiler_params=pltpu.CompilerParams(
            dimension_semantics=("parallel",),
            # Note (v7x, 64 MiB VMEM): with bf16 weights even D=1024/Dff=4096 keeps
            # residency at ~16 MiB; set vmem_limit_bytes explicitly if weights grow,
            # or chunk Dff as an "arbitrary" reduction axis.
        ),
        cost_estimate=cost,
    )(x2p, params["ln_in_w"], params["ln_in_b"], w1, params["b1"],
      w2, params["b2"], params["ln_out_w"], params["ln_out_b"])
    return out[:M].reshape(B, L, D)


# ---------------------------------------------------------------------------
# General path kernels (used when a real Mixer replaces the identity stand-in)
# ---------------------------------------------------------------------------
def row_ln_kernel(x_ref, w_ref, b_ref, o_ref):
    x = x_ref[...].astype(jnp.float32)
    o_ref[...] = _layernorm_f32(x, w_ref[...], b_ref[...]).astype(o_ref.dtype)


def input_layernorm(seq, w, b, *, tm=512):
    """Row-tiled LayerNorm over the cross-scanned sequence, flattened to (B*4L, D)."""
    B, L4, D = seq.shape
    M = B * L4
    x2 = seq.reshape(M, D)
    TM = min(tm, _round_up(M, 8))
    Mp = _round_up(M, TM)
    x2p = _pad_rows(x2, Mp)
    out = pl.pallas_call(
        row_ln_kernel,
        out_shape=jax.ShapeDtypeStruct((Mp, D), seq.dtype),
        grid=(Mp // TM,),
        in_specs=[
            pl.BlockSpec((TM, D), lambda i: (i, 0)),
            pl.BlockSpec((1, D), lambda i: (0, 0)),
            pl.BlockSpec((1, D), lambda i: (0, 0)),
        ],
        out_specs=pl.BlockSpec((TM, D), lambda i: (i, 0)),
        compiler_params=pltpu.CompilerParams(dimension_semantics=("parallel",)),
    )(x2p, w, b)
    return out[:M].reshape(B, L4, D)


def mlp_output_kernel(mix_ref, res_ref, w1_ref, b1_ref, w2_ref, b2_ref,
                      low_ref, lob_ref, o_ref):
    b1 = b1_ref[...]
    b2 = b2_ref[...]
    low = low_ref[...]
    lob = lob_ref[...]

    res = res_ref[...]
    cdt = w1_ref.dtype
    h = jnp.dot(res.astype(cdt), w1_ref[...], preferred_element_type=jnp.float32) + b1
    h = jnp.maximum(h, 0.0)
    ff = jnp.dot(h.astype(cdt), w2_ref[...], preferred_element_type=jnp.float32) + b2
    z = 2.0 * mix_ref[...].astype(jnp.float32) + ff
    o_ref[...] = _layernorm_f32(z, low, lob).astype(o_ref.dtype)


def mlp_output(mixer_out, residual, params, *, tm=256):
    """Row-tiled fused PhiMLP + (2*mix + ff) + output LayerNorm."""
    B, L, D = residual.shape
    M = B * L
    Dff = params["w1"].shape[1]
    TM = min(tm, _round_up(M, 8))
    Mp = _round_up(M, TM)
    mix2 = _pad_rows(mixer_out.reshape(M, D), Mp)
    res2 = _pad_rows(residual.reshape(M, D), Mp)

    w1, w2 = params["w1"], params["w2"]
    cost = pl.CostEstimate(
        flops=4 * Mp * D * Dff,
        transcendentals=0,
        bytes_accessed=int(3 * Mp * D * residual.dtype.itemsize
                           + D * Dff * (w1.dtype.itemsize + w2.dtype.itemsize)),
    )

    out = pl.pallas_call(
        mlp_output_kernel,
        out_shape=jax.ShapeDtypeStruct((Mp, D), residual.dtype),
        grid=(Mp // TM,),
        in_specs=[
            pl.BlockSpec((TM, D), lambda i: (i, 0)),      # mixer output tile
            pl.BlockSpec((TM, D), lambda i: (i, 0)),      # residual tile
            pl.BlockSpec((D, Dff), lambda i: (0, 0)),     # w1 (resident, bf16)
            pl.BlockSpec((1, Dff), lambda i: (0, 0)),
            pl.BlockSpec((Dff, D), lambda i: (0, 0)),     # w2 (resident, bf16)
            pl.BlockSpec((1, D), lambda i: (0, 0)),
            pl.BlockSpec((1, D), lambda i: (0, 0)),
            pl.BlockSpec((1, D), lambda i: (0, 0)),
        ],
        out_specs=pl.BlockSpec((TM, D), lambda i: (i, 0)),
        compiler_params=pltpu.CompilerParams(dimension_semantics=("parallel",)),
        cost_estimate=cost,
    )(mix2, res2, w1, params["b1"], w2, params["b2"],
      params["ln_out_w"], params["ln_out_b"])
    return out[:M].reshape(B, L, D)


# ---------------------------------------------------------------------------
# CrossScan / CrossMerge (pure index shuffling -> plain JAX glue)
# ---------------------------------------------------------------------------
def cross_scan(x_bld, H, W):
    B, L, D = x_bld.shape
    x_bdhw = jnp.transpose(x_bld.reshape(B, H, W, D), (0, 3, 1, 2))      # b d h w
    xs0 = x_bdhw.reshape(B, D, L)                                        # row-major scan
    xs1 = jnp.transpose(x_bdhw, (0, 1, 3, 2)).reshape(B, D, L)           # col-major scan
    xs = jnp.stack([xs0, xs1, xs0[..., ::-1], xs1[..., ::-1]], axis=1)   # (B,4,D,L)
    # rearrange 'b c d l -> b (c l) d'
    return jnp.transpose(xs, (0, 1, 3, 2)).reshape(B, 4 * L, D)


def cross_merge(seq, H, W):
    B, L4, D = seq.shape
    L = L4 // 4
    # rearrange 'b (c l) d -> b c d l'
    ys = jnp.transpose(seq.reshape(B, 4, L, D), (0, 1, 3, 2))            # (B,4,D,L)
    ys = ys[:, 0:2] + ys[:, 2:4][..., ::-1]                              # (B,2,D,L)
    y1 = jnp.transpose(ys[:, 1].reshape(B, D, W, H), (0, 1, 3, 2)).reshape(B, D, L)
    y = ys[:, 0] + y1                                                    # (B,D,L)
    return jnp.transpose(y, (0, 2, 1))                                   # (B,L,D)


# ---------------------------------------------------------------------------
# Block forward
# ---------------------------------------------------------------------------
def block_forward(x, params, *, use_fused_identity_mixer=True):
    B, L, D = x.shape
    H = W = int(math.sqrt(L))
    assert H * W == L

    if use_fused_identity_mixer:
        # TODO(synk): valid only while the external Mixer (config.CoreType) is an
        # identity stand-in; the collapse cross_scan->LN->cross_merge == 4*LN(x)
        # lets us skip materializing the (B, 4L, D) tensor entirely.
        return fused_block_forward(x, params)

    residual = x
    seq = cross_scan(x, H, W)                                            # (B, 4L, D)
    seq = input_layernorm(seq, params["ln_in_w"], params["ln_in_b"])
    # TODO(synk): Mixer is dynamically imported from config.CoreType (Mamba-style
    # core) and is not available here; identity stand-in for its forward.
    mixer_seq = seq
    mixer_out = cross_merge(mixer_seq, H, W).astype(residual.dtype)      # (B, L, D)
    # resid_dropout treated as eval-mode identity.
    return mlp_output(mixer_out, residual, params)


# ---------------------------------------------------------------------------
# Pure-JAX reference (explicit cross_scan / cross_merge path, same bf16 matmuls)
# ---------------------------------------------------------------------------
def block_forward_ref(x, params):
    B, L, D = x.shape
    H = W = int(math.sqrt(L))
    cdt = params["w1"].dtype
    seq = cross_scan(x, H, W).astype(jnp.float32)
    seq = _layernorm_f32(seq, params["ln_in_w"][0], params["ln_in_b"][0])
    mixer_out = cross_merge(seq.astype(x.dtype), H, W).astype(jnp.float32)
    h = jnp.dot(x.astype(cdt), params["w1"],
                preferred_element_type=jnp.float32) + params["b1"][0]
    h = jnp.maximum(h, 0.0)
    ff = jnp.dot(h.astype(cdt), params["w2"],
                 preferred_element_type=jnp.float32) + params["b2"][0]
    z = 2.0 * mixer_out + ff
    return _layernorm_f32(z, params["ln_out_w"][0], params["ln_out_b"][0]).astype(x.dtype)


# ---------------------------------------------------------------------------
def make_params(key, D, *, mlp_dtype=jnp.bfloat16):
    Dff = 4 * D
    k1, k2, k3, k4, k5, k6 = jax.random.split(key, 6)
    s1 = 1.0 / math.sqrt(D)
    s2 = 1.0 / math.sqrt(Dff)
    return {
        # LayerNorms (deterministic perturbation of the PyTorch default init)
        "ln_in_w": (1.0 + 0.1 * jax.random.normal(k1, (1, D))).astype(jnp.float32),
        "ln_in_b": (0.01 * jax.random.normal(k2, (1, D))).astype(jnp.float32),
        "ln_out_w": (1.0 + 0.1 * jax.random.normal(k3, (1, D))).astype(jnp.float32),
        "ln_out_b": (0.01 * jax.random.normal(k4, (1, D))).astype(jnp.float32),
        # PhiMLP fc1 / fc2 (stored transposed for x @ W); bf16 -> native MXU rate
        # and half the weight DMA / VMEM footprint.
        "w1": (s1 * jax.random.normal(k5, (D, Dff))).astype(mlp_dtype),
        "b1": jnp.zeros((1, Dff), jnp.float32),
        "w2": (s2 * jax.random.normal(k6, (Dff, D))).astype(mlp_dtype),
        "b2": jnp.zeros((1, D), jnp.float32),
    }


if __name__ == "__main__":
    # L must be a perfect square (H = W = 8); D lane-aligned (multiple of 128).
    B, L, D = 2, 64, 128
    key = jax.random.PRNGKey(0)
    kx, kp = jax.random.split(key)
    x = jax.random.normal(kx, (B, L, D), dtype=jnp.float32)
    params = make_params(kp, D)

    out_fused = jax.block_until_ready(block_forward(x, params))
    out_general = jax.block_until_ready(
        block_forward(x, params, use_fused_identity_mixer=False))
    ref = jax.block_until_ready(block_forward_ref(x, params))

    assert out_fused.shape == (B, L, D)
    err_fused = float(jnp.max(jnp.abs(out_fused - ref)))
    err_general = float(jnp.max(jnp.abs(out_general - ref)))
    assert err_fused < 1e-2, f"fused path max abs err {err_fused}"
    assert err_general < 1e-2, f"general path max abs err {err_general}"
    print("KERNEL_OK")
</pallas_src>

<mosaic_0001>
module attributes {stable_mosaic.version = 11 : i64} {
  func.func @fused_block_kernel(%arg0: i32, %arg1: memref<128x128xf32, #tpu.memory_space<vmem>>, %arg2: memref<1x128xf32, #tpu.memory_space<vmem>>, %arg3: memref<1x128xf32, #tpu.memory_space<vmem>>, %arg4: memref<128x512xbf16, #tpu.memory_space<vmem>>, %arg5: memref<1x512xf32, #tpu.memory_space<vmem>>, %arg6: memref<512x128xbf16, #tpu.memory_space<vmem>>, %arg7: memref<1x128xf32, #tpu.memory_space<vmem>>, %arg8: memref<1x128xf32, #tpu.memory_space<vmem>>, %arg9: memref<1x128xf32, #tpu.memory_space<vmem>>, %arg10: memref<128x128xf32, #tpu.memory_space<vmem>>) attributes {dimension_semantics = [#tpu.dimension_semantics<parallel>], iteration_bounds = array<i64: 1>, scalar_prefetch = 0 : i64, scratch_operands = 0 : i64, tpu.core_type = #tpu.core_type<tc>, window_params = [{transform_indices = @transform_0, window_bounds = array<i64: 128, 128>}, {pipeline_mode = #tpu.pipeline_mode<synchronous>, transform_indices = @transform_1, window_bounds = array<i64: 1, 128>}, {pipeline_mode = #tpu.pipeline_mode<synchronous>, transform_indices = @transform_2, window_bounds = array<i64: 1, 128>}, {pipeline_mode = #tpu.pipeline_mode<synchronous>, transform_indices = @transform_3, window_bounds = array<i64: 128, 512>}, {pipeline_mode = #tpu.pipeline_mode<synchronous>, transform_indices = @transform_4, window_bounds = array<i64: 1, 512>}, {pipeline_mode = #tpu.pipeline_mode<synchronous>, transform_indices = @transform_5, window_bounds = array<i64: 512, 128>}, {pipeline_mode = #tpu.pipeline_mode<synchronous>, transform_indices = @transform_6, window_bounds = array<i64: 1, 128>}, {pipeline_mode = #tpu.pipeline_mode<synchronous>, transform_indices = @transform_7, window_bounds = array<i64: 1, 128>}, {pipeline_mode = #tpu.pipeline_mode<synchronous>, transform_indices = @transform_8, window_bounds = array<i64: 1, 128>}, {transform_indices = @transform_9, window_bounds = array<i64: 128, 128>}]} {
    %c0 = arith.constant 0 : index
    %c0_0 = arith.constant 0 : index
    %0 = vector.load %arg2[%c0, %c0_0] : memref<1x128xf32, #tpu.memory_space<vmem>>, vector<1x128xf32>
    %c0_1 = arith.constant 0 : index
    %c0_2 = arith.constant 0 : index
    %1 = vector.load %arg3[%c0_1, %c0_2] : memref<1x128xf32, #tpu.memory_space<vmem>>, vector<1x128xf32>
    %c0_3 = arith.constant 0 : index
    %c0_4 = arith.constant 0 : index
    %2 = vector.load %arg5[%c0_3, %c0_4] : memref<1x512xf32, #tpu.memory_space<vmem>>, vector<1x512xf32>
    %c0_5 = arith.constant 0 : index
    %c0_6 = arith.constant 0 : index
    %3 = vector.load %arg7[%c0_5, %c0_6] : memref<1x128xf32, #tpu.memory_space<vmem>>, vector<1x128xf32>
    %c0_7 = arith.constant 0 : index
    %c0_8 = arith.constant 0 : index
    %4 = vector.load %arg8[%c0_7, %c0_8] : memref<1x128xf32, #tpu.memory_space<vmem>>, vector<1x128xf32>
    %c0_9 = arith.constant 0 : index
    %c0_10 = arith.constant 0 : index
    %5 = vector.load %arg9[%c0_9, %c0_10] : memref<1x128xf32, #tpu.memory_space<vmem>>, vector<1x128xf32>
    %c0_11 = arith.constant 0 : index
    %c0_12 = arith.constant 0 : index
    %6 = vector.load %arg1[%c0_11, %c0_12] : memref<128x128xf32, #tpu.memory_space<vmem>>, vector<128x128xf32>
    %cst = arith.constant dense<0.000000e+00> : vector<128xf32>
    %7 = vector.multi_reduction <add>, %6, %cst [1] : vector<128x128xf32> to vector<128xf32>
    %8 = vector.shape_cast %7 : vector<128xf32> to vector<128x1xf32>
    %cst_13 = arith.constant 1.280000e+02 : f32
    %9 = vector.broadcast %cst_13 : f32 to vector<128x1xf32>
    %10 = arith.divf %8, %9 : vector<128x1xf32>
    %11 = vector.broadcast %10 : vector<128x1xf32> to vector<128x128xf32>
    %12 = arith.subf %6, %11 : vector<128x128xf32>
    %13 = arith.mulf %12, %12 : vector<128x128xf32>
    %cst_14 = arith.constant dense<0.000000e+00> : vector<128xf32>
    %14 = vector.multi_reduction <add>, %13, %cst_14 [1] : vector<128x128xf32> to vector<128xf32>
    %15 = vector.shape_cast %14 : vector<128xf32> to vector<128x1xf32>
    %cst_15 = arith.constant 1.280000e+02 : f32
    %16 = vector.broadcast %cst_15 : f32 to vector<128x1xf32>
    %17 = arith.divf %15, %16 : vector<128x1xf32>
    %cst_16 = arith.constant 9.99999974E-6 : f32
    %18 = vector.broadcast %cst_16 : f32 to vector<128x1xf32>
    %19 = arith.addf %17, %18 : vector<128x1xf32>
    %20 = math.rsqrt %19 : vector<128x1xf32>
    %21 = vector.broadcast %20 : vector<128x1xf32> to vector<128x128xf32>
    %22 = arith.mulf %12, %21 : vector<128x128xf32>
    %23 = vector.broadcast %0 : vector<1x128xf32> to vector<128x128xf32>
    %24 = arith.mulf %22, %23 : vector<128x128xf32>
    %25 = vector.broadcast %1 : vector<1x128xf32> to vector<128x128xf32>
    %26 = arith.addf %24, %25 : vector<128x128xf32>
    %cst_17 = arith.constant 4.000000e+00 : f32
    %27 = vector.broadcast %cst_17 : f32 to vector<128x128xf32>
    %28 = arith.mulf %27, %26 : vector<128x128xf32>
    %29 = arith.truncf %6 : vector<128x128xf32> to vector<128x128xbf16>
    %c0_18 = arith.constant 0 : index
    %c0_19 = arith.constant 0 : index
    %30 = vector.load %arg4[%c0_18, %c0_19] : memref<128x512xbf16, #tpu.memory_space<vmem>>, vector<128x512xbf16>
    %cst_20 = arith.constant dense<0.000000e+00> : vector<128x512xf32>
    %31 = tpu.matmul %29, %30, %cst_20 {dimension_numbers = #tpu.dot_dimension_numbers<[1], [0], [0], [1], [0, 0, 1, 1], [], []>} : vector<128x128xbf16>, vector<128x512xbf16>, vector<128x512xf32> -> vector<128x512xf32>
    %32 = vector.broadcast %2 : vector<1x512xf32> to vector<128x512xf32>
    %33 = arith.addf %31, %32 : vector<128x512xf32>
    %cst_21 = arith.constant 0.000000e+00 : f32
    %34 = vector.broadcast %cst_21 : f32 to vector<128x512xf32>
    %35 = arith.maximumf %33, %34 : vector<128x512xf32>
    %36 = arith.truncf %35 : vector<128x512xf32> to vector<128x512xbf16>
    %c0_22 = arith.constant 0 : index
    %c0_23 = arith.constant 0 : index
    %37 = vector.load %arg6[%c0_22, %c0_23] : memref<512x128xbf16, #tpu.memory_space<vmem>>, vector<512x128xbf16>
    %cst_24 = arith.constant dense<0.000000e+00> : vector<128x128xf32>
    %38 = tpu.matmul %36, %37, %cst_24 {dimension_numbers = #tpu.dot_dimension_numbers<[1], [0], [0], [1], [0, 0, 1, 1], [], []>} : vector<128x512xbf16>, vector<512x128xbf16>, vector<128x128xf32> -> vector<128x128xf32>
    %39 = vector.broadcast %3 : vector<1x128xf32> to vector<128x128xf32>
    %40 = arith.addf %38, %39 : vector<128x128xf32>
    %cst_25 = arith.constant 2.000000e+00 : f32
    %41 = vector.broadcast %cst_25 : f32 to vector<128x128xf32>
    %42 = arith.mulf %41, %28 : vector<128x128xf32>
    %43 = arith.addf %42, %40 : vector<128x128xf32>
    %cst_26 = arith.constant dense<0.000000e+00> : vector<128xf32>
    %44 = vector.multi_reduction <add>, %43, %cst_26 [1] : vector<128x128xf32> to vector<128xf32>
    %45 = vector.shape_cast %44 : vector<128xf32> to vector<128x1xf32>
    %cst_27 = arith.constant 1.280000e+02 : f32
    %46 = vector.broadcast %cst_27 : f32 to vector<128x1xf32>
    %47 = arith.divf %45, %46 : vector<128x1xf32>
    %48 = vector.broadcast %47 : vector<128x1xf32> to vector<128x128xf32>
    %49 = arith.subf %43, %48 : vector<128x128xf32>
    %50 = arith.mulf %49, %49 : vector<128x128xf32>
    %cst_28 = arith.constant dense<0.000000e+00> : vector<128xf32>
    %51 = vector.multi_reduction <add>, %50, %cst_28 [1] : vector<128x128xf32> to vector<128xf32>
    %52 = vector.shape_cast %51 : vector<128xf32> to vector<128x1xf32>
    %cst_29 = arith.constant 1.280000e+02 : f32
    %53 = vector.broadcast %cst_29 : f32 to vector<128x1xf32>
    %54 = arith.divf %52, %53 : vector<128x1xf32>
    %cst_30 = arith.constant 9.99999974E-6 : f32
    %55 = vector.broadcast %cst_30 : f32 to vector<128x1xf32>
    %56 = arith.addf %54, %55 : vector<128x1xf32>
    %57 = math.rsqrt %56 : vector<128x1xf32>
    %58 = vector.broadcast %57 : vector<128x1xf32> to vector<128x128xf32>
    %59 = arith.mulf %49, %58 : vector<128x128xf32>
    %60 = vector.broadcast %4 : vector<1x128xf32> to vector<128x128xf32>
    %61 = arith.mulf %59, %60 : vector<128x128xf32>
    %62 = vector.broadcast %5 : vector<1x128xf32> to vector<128x128xf32>
    %63 = arith.addf %61, %62 : vector<128x128xf32>
    %c0_31 = arith.constant 0 : index
    %c0_32 = arith.constant 0 : index
    %64 = vector.load %arg10[%c0_31, %c0_32] : memref<128x128xf32, #tpu.memory_space<vmem>>, vector<128x128xf32>
    tpu.vector_store %arg10[%c0_31, %c0_32], %63 {strides = array<i32>} : memref<128x128xf32, #tpu.memory_space<vmem>>, vector<128x128xf32>,
    return
  }
  func.func @transform_0(%arg0: i32) -> (i32, i32) {
    %c0_i32 = arith.constant 0 : i32
    %c0_i32_0 = arith.constant 0 : i32
    return %arg0, %c0_i32 : i32, i32
  }
  func.func @transform_1(%arg0: i32) -> (i32, i32) {
    %c0_i32 = arith.constant 0 : i32
    %c0_i32_0 = arith.constant 0 : i32
    %c0_i32_1 = arith.constant 0 : i32
    return %c0_i32, %c0_i32_0 : i32, i32
  }
  func.func @transform_2(%arg0: i32) -> (i32, i32) {
    %c0_i32 = arith.constant 0 : i32
    %c0_i32_0 = arith.constant 0 : i32
    %c0_i32_1 = arith.constant 0 : i32
    return %c0_i32, %c0_i32_0 : i32, i32
  }
  func.func @transform_3(%arg0: i32) -> (i32, i32) {
    %c0_i32 = arith.constant 0 : i32
    %c0_i32_0 = arith.constant 0 : i32
    %c0_i32_1 = arith.constant 0 : i32
    return %c0_i32, %c0_i32_0 : i32, i32
  }
  func.func @transform_4(%arg0: i32) -> (i32, i32) {
    %c0_i32 = arith.constant 0 : i32
    %c0_i32_0 = arith.constant 0 : i32
    %c0_i32_1 = arith.constant 0 : i32
    return %c0_i32, %c0_i32_0 : i32, i32
  }
  func.func @transform_5(%arg0: i32) -> (i32, i32) {
    %c0_i32 = arith.constant 0 : i32
    %c0_i32_0 = arith.constant 0 : i32
    %c0_i32_1 = arith.constant 0 : i32
    return %c0_i32, %c0_i32_0 : i32, i32
  }
  func.func @transform_6(%arg0: i32) -> (i32, i32) {
    %c0_i32 = arith.constant 0 : i32
    %c0_i32_0 = arith.constant 0 : i32
    %c0_i32_1 = arith.constant 0 : i32
    return %c0_i32, %c0_i32_0 : i32, i32
  }
  func.func @transform_7(%arg0: i32) -> (i32, i32) {
    %c0_i32 = arith.constant 0 : i32
    %c0_i32_0 = arith.constant 0 : i32
    %c0_i32_1 = arith.constant 0 : i32
    return %c0_i32, %c0_i32_0 : i32, i32
  }
  func.func @transform_8(%arg0: i32) -> (i32, i32) {
    %c0_i32 = arith.constant 0 : i32
    %c0_i32_0 = arith.constant 0 : i32
    %c0_i32_1 = arith.constant 0 : i32
    return %c0_i32, %c0_i32_0 : i32, i32
  }
  func.func @transform_9(%arg0: i32) -> (i32, i32) {
    %c0_i32 = arith.constant 0 : i32
    %c0_i32_0 = arith.constant 0 : i32
    return %arg0, %c0_i32 : i32, i32
  }
}

</mosaic_0001>

<bundles_post_ra>
// kernel: tpu_custom_call.1
= control target key start
LH: loop header
LB: loop body
LE: loop exit
PB: predicated region body
PF: predicated region fallthrough
CT: control target
= control target key end

     0   :  { %14 = vsyncpa [#allocation3], 0  ;;  %s3463_s0 = inlined_call_operand.hbm [shape: f32[128,128], index: 0, kind: input, shape index: {}]   ;;  %s3464_s1 = inlined_call_operand.hbm [shape: f32[1,128], index: 1, kind: input, shape index: {}]   ;;  %s3465_s2 = inlined_call_operand.vmem [shape: f32[1,128], index: 2, kind: input, shape index: {}]   ;;  %s3466_s3 = inlined_call_operand.hbm [shape: bf16[128,512], index: 3, kind: input, shape index: {}]   ;;  %s3467_s4 = inlined_call_operand.hbm [shape: f32[1,512], index: 4, kind: input, shape index: {}]   ;;  %s3468_s5 = inlined_call_operand.hbm [shape: bf16[512,128], index: 5, kind: input, shape index: {}]   ;;  %s3469_s6 = inlined_call_operand.vmem [shape: f32[1,128], index: 6, kind: input, shape index: {}]   ;;  %s3470_s7 = inlined_call_operand.vmem [shape: f32[1,128], index: 7, kind: input, shape index: {}]   ;;  %s3471_s8 = inlined_call_operand.vmem [shape: f32[1,128], index: 8, kind: input, shape index: {}]   ;;  %s3472_s9 = inlined_call_operand.hbm [shape: f32[128,128], index: 9, kind: output, shape index: {}]  }
   0x1   :  { %15 = vsyncpa [#allocation6], 0 }
   0x2   :  { %16 = vsyncpa [#allocation9], 0  ;;  %s36_s11 = sshll.u32 %s3464_s1, 4  ;;  %s37_s11 = int_to_ptr.hbm [resolvable:$true] %s36_s11 }
   0x3   :  { %17 = vsyncpa [#allocation4], 0  ;;  %s2449_s12 = smov [#allocation5]   ;;  %s62_s16 = sshll.u32 %s3467_s4, 4  ;;  %s63_s16 = int_to_ptr.hbm [resolvable:$true] %s62_s16 }
   0x4   :  { %s38_s13 = sshll.u32 %s2449_s12, 4  ;;  %s2450_s17 = smov [#allocation8]   ;;  %s39_s13 = int_to_ptr.vmem [resolvable:$true] %s38_s13 }
   0x5   :  { %41 = dma.hbm_to_vmem [thread:$0]  %s37_s11, 16, %s39_s13, [#allocation6]  }
   0x6   :  { %s64_s18 = sshll.u32 %s2450_s17, 4  ;;  %s22_s21 = sshll.u32 %s3463_s0, 4  ;;  %s65_s18 = int_to_ptr.vmem [resolvable:$true] %s64_s18  ;;  %s23_s21 = int_to_ptr.hbm [resolvable:$true] %s22_s21 }
   0x7   :  { %67 = dma.hbm_to_vmem [thread:$0]  %s63_s16, 64, %s65_s18, [#allocation9]  }
   0x8   :  { %s2451_s1 = smov [#allocation2]   ;;  %s48_s25 = sshll.u32 %s3466_s3, 4  ;;  %s49_s25 = int_to_ptr.hbm [resolvable:$true] %s48_s25 }
   0x9   :  { %s24_s22 = sshll.u32 %s2451_s1, 4  ;;  %s2452_s26 = smov 128   ;;  %s25_s22 = int_to_ptr.vmem [resolvable:$true] %s24_s22 }
   0xa   :  { %s2453_s4 = smov 8   ;;  %s2454_s27 = smov [#allocation7]  }
   0xb   :  { %30 = dma.hbm_to_vmem [thread:$0]  %s23_s21, 2048, %s25_s22, [#allocation3], %s2452_s26, %s2452_s26, %s2453_s4  }
   0xc   :  { %s50_s28 = sshll.u32 %s2454_s27, 4  ;;  %s2455_s0 = smov 256   ;;  %s51_s28 = int_to_ptr.vmem [resolvable:$true] %s50_s28 }
   0xd   :  { %s2456_s29 = smov 16   ;;  %s72_s11 = sshll.u32 %s3468_s5, 4  ;;  %s73_s11 = int_to_ptr.hbm [resolvable:$true] %s72_s11 }
   0xe   :  { %56 = dma.hbm_to_vmem [thread:$0]  %s49_s25, 4096, %s51_s28, [#allocation6], %s2455_s0, %s2455_s0, %s2456_s29  }
   0xf   :  { %s2457_s12 = smov [#allocation10]   ;;  %s2458_s13 = smov 64  }
  0x10   :  { %s74_s3 = sshll.u32 %s2457_s12, 4  ;;  %s2459_s14 = smov 4   ;;  %s75_s3 = int_to_ptr.vmem [resolvable:$true] %s74_s3 }
  0x11   :  { %80 = dma.hbm_to_vmem [thread:$0]  %s73_s11, 4096, %s75_s3, [#allocation9], %s2458_s13, %s2458_s13, %s2459_s14  }
  0x12   :  { %2441 = dma.done.wait [#allocation3], 2048  }
  0x13   :  { %2442 = vsyncadd [#allocation3], 4294965248 }
  0x14   :  { %2443 = dma.done.wait [#allocation6], 4112  }
  0x15   :  { %2444 = vsyncadd [#allocation6], 4294963184 }
  0x16   :  { %2445 = dma.done.wait [#allocation9], 4160  }
  0x17   :  { %2446 = vsyncadd [#allocation9], 4294963136  ;;  %v2530_v0 = vld [vmem:[#allocation2 + $0x20] sm:$0xff]  ;;  %v2532_v1 = vld [vmem:[#allocation2 + $0x10] sm:$0xff]  ;;  %s1878_s1 = sshll.u32 %s3472_s9, 4  ;;  %s1879_s1 = int_to_ptr.hbm [resolvable:$true] %s1878_s1 }
  0x18   :  { %v2534_v2 = vld [vmem:[#allocation2] sm:$0xff]  ;;  %137 = vadd.xlane.f32.xlu2 %v2530_v0  ;;  %133 = vadd.xlane.f32.xlu1 %v2532_v1  ;;  %v2179_v4 = vld [vmem:[#allocation7 + $0xec] sm:$0xf0]  ;;  %v2009_v7 = vld [vmem:[#allocation7 + $0xf0] sm:$0xf0] }
  0x19   :  { %v2007_v3 = vld [vmem:[#allocation7 + $0xe0] sm:$0xf]  ;;  %v2177_v5 = vld [vmem:[#allocation7 + $0xe4] sm:$0xf]  ;;  %129 = vadd.xlane.f32.xlu0 %v2534_v2  ;;  %v2015_v8 = vld [vmem:[#allocation7 + $0xe8] sm:$0xf] }
  0x1a   :  { %v2008_v6 = vor.u32 %v2179_v4, %v2007_v3  ;;  %v2180_v9 = vld [vmem:[#allocation7 + $0xf4] sm:$0xf0]  ;;  %v2012_v10 = vor.u32 %v2177_v5, %v2009_v7  ;;  %v2178_v12 = vld [vmem:[#allocation7 + $0xec] sm:$0xf]  ;;  %v2017_v13 = vld [vmem:[#allocation7 + $0xf8] sm:$0xf0] }
  0x1b   :  { %v2016_v11 = vor.u32 %v2180_v9, %v2015_v8  ;;  %v1991_v14 = vld [vmem:[#allocation7 + $0xc0] sm:$0xf]  ;;  %v2020_v15 = vor.u32 %v2178_v12, %v2017_v13  ;;  %v2175_v16 = vld [vmem:[#allocation7 + $0xcc] sm:$0xf0]  ;;  %v2173_v17 = vld [vmem:[#allocation7 + $0xc4] sm:$0xf] }
  0x1c   :  { %719 = vmatpush.bf16.msra.mxu0 %v2008_v6  ;;  %v1993_v18 = vld [vmem:[#allocation7 + $0xd0] sm:$0xf0]  ;;  %768 = vmatpush.bf16.msra.mxu1 %v2012_v10  ;;  %v1992_v19 = vor.u32 %v2175_v16, %v1991_v14  ;;  %v1999_v21 = vld [vmem:[#allocation7 + $0xc8] sm:$0xf]  ;;  %v2176_v22 = vld [vmem:[#allocation7 + $0xd4] sm:$0xf0] }
  0x1d   :  { %817 = vmatpush.bf16.msra.mxu2 %v2016_v11  ;;  %v1996_v20 = vor.u32 %v2173_v17, %v1993_v18  ;;  %v2174_v23 = vld [vmem:[#allocation7 + $0xcc] sm:$0xf]  ;;  %866 = vmatpush.bf16.msra.mxu3 %v2020_v15  ;;  %v2000_v24 = vor.u32 %v2176_v22, %v1999_v21  ;;  %v2001_v25 = vld [vmem:[#allocation7 + $0xd8] sm:$0xf0]  ;;  %v1975_v30 = vld [vmem:[#allocation7 + $0xa0] sm:$0xf] }
  0x1e   :  { %v2539_v26 = vld [vmem:[#allocation2 + $0x28] sm:$0xff]  ;;  %v2541_v27 = vld [vmem:[#allocation2 + $0x18] sm:$0xff]  ;;  %v2004_v28 = vor.u32 %v2174_v23, %v2001_v25  ;;  %v2171_v31 = vld [vmem:[#allocation7 + $0xac] sm:$0xf0] }
  0x1f   :  { %v2543_v29 = vld [vmem:[#allocation2 + $0x8] sm:$0xff]  ;;  %v1976_v32 = vor.u32 %v2171_v31, %v1975_v30  ;;  %v1977_v34 = vld [vmem:[#allocation7 + $0xb0] sm:$0xf0]  ;;  %v2172_v37 = vld [vmem:[#allocation7 + $0xb4] sm:$0xf0] }
  0x20   :  { %720 = vmatpush.bf16.msra.mxu0 %v1992_v19  ;;  %v2169_v33 = vld [vmem:[#allocation7 + $0xa4] sm:$0xf]  ;;  %v1983_v35 = vld [vmem:[#allocation7 + $0xa8] sm:$0xf]  ;;  %769 = vmatpush.bf16.msra.mxu1 %v1996_v20  ;;  %v2170_v38 = vld [vmem:[#allocation7 + $0xac] sm:$0xf] }
  0x21   :  { %818 = vmatpush.bf16.msra.mxu2 %v2000_v24  ;;  %v1980_v36 = vor.u32 %v2169_v33, %v1977_v34  ;;  %v1985_v39 = vld [vmem:[#allocation7 + $0xb8] sm:$0xf0]  ;;  %867 = vmatpush.bf16.msra.mxu3 %v2004_v28  ;;  %v1984_v40 = vor.u32 %v2172_v37, %v1983_v35  ;;  %v1959_v42 = vld [vmem:[#allocation7 + $0x80] sm:$0xf]  ;;  %v2167_v43 = vld [vmem:[#allocation7 + $0x8c] sm:$0xf0] }
  0x22   :  { %139 = vadd.xlane.f32.xlu2 %v2539_v26  ;;  %v1988_v41 = vor.u32 %v2170_v38, %v1985_v39  ;;  %v2165_v44 = vld [vmem:[#allocation7 + $0x84] sm:$0xf]  ;;  %135 = vadd.xlane.f32.xlu1 %v2541_v27  ;;  %v1961_v45 = vld [vmem:[#allocation7 + $0x90] sm:$0xf0]  ;;  %v1967_v46 = vld [vmem:[#allocation7 + $0x88] sm:$0xf]  ;;  %v1960_v48 = vor.u32 %v2167_v43, %v1959_v42 }
  0x23   :  { %131 = vadd.xlane.f32.xlu0 %v2543_v29  ;;  %v2168_v47 = vld [vmem:[#allocation7 + $0x94] sm:$0xf0]  ;;  %v2166_v49 = vld [vmem:[#allocation7 + $0x8c] sm:$0xf]  ;;  %v1969_v50 = vld [vmem:[#allocation7 + $0x98] sm:$0xf0]  ;;  %v1964_v51 = vor.u32 %v2165_v44, %v1961_v45 }
  0x24   :  { %721 = vmatpush.bf16.msra.mxu0 %v1976_v32  ;;  %770 = vmatpush.bf16.msra.mxu1 %v1980_v36  ;;  %v1968_v52 = vor.u32 %v2168_v47, %v1967_v46  ;;  %v2548_v53 = vld [vmem:[#allocation2 + $0x40] sm:$0xff]  ;;  %v2163_v55 = vld [vmem:[#allocation7 + $0x6c] sm:$0xf0]  ;;  %v1972_v56 = vor.u32 %v2166_v49, %v1969_v50  ;;  %v1945_v58 = vld [vmem:[#allocation7 + $0x70] sm:$0xf0]  ;;  %v510_v50 = vpack.c.bf16 %v2543_v29, %v2534_v2 }
  0x25   :  { %819 = vmatpush.bf16.msra.mxu2 %v1984_v40  ;;  %v1943_v54 = vld [vmem:[#allocation7 + $0x60] sm:$0xf]  ;;  %868 = vmatpush.bf16.msra.mxu3 %v1988_v41  ;;  %v2161_v57 = vld [vmem:[#allocation7 + $0x64] sm:$0xf]  ;;  %v1951_v59 = vld [vmem:[#allocation7 + $0x68] sm:$0xf] }
  0x26   :  { %v2164_v60 = vld [vmem:[#allocation7 + $0x74] sm:$0xf0]  ;;  %v2162_v61 = vld [vmem:[#allocation7 + $0x6c] sm:$0xf]  ;;  %v1953_v62 = vld [vmem:[#allocation7 + $0x78] sm:$0xf0]  ;;  %v1944_v3 = vor.u32 %v2163_v55, %v1943_v54  ;;  %v1948_v4 = vor.u32 %v2161_v57, %v1945_v58 }
  0x27   :  { %v2550_v63 = vld [vmem:[#allocation2 + $0x30] sm:$0xff]  ;;  %v1952_v5 = vor.u32 %v2164_v60, %v1951_v59  ;;  %v1927_v6 = vld [vmem:[#allocation7 + $0x40] sm:$0xf]  ;;  %v2157_v8 = vld [vmem:[#allocation7 + $0x44] sm:$0xf]  ;;  %v1956_v9 = vor.u32 %v2162_v61, %v1953_v62 }
  0x28   :  { %722 = vmatpush.bf16.msra.mxu0 %v1960_v48  ;;  %771 = vmatpush.bf16.msra.mxu1 %v1964_v51  ;;  %v2159_v7 = vld [vmem:[#allocation7 + $0x4c] sm:$0xf0]  ;;  %v1929_v10 = vld [vmem:[#allocation7 + $0x50] sm:$0xf0]  ;;  %v1935_v11 = vld [vmem:[#allocation7 + $0x48] sm:$0xf] }
  0x29   :  { %820 = vmatpush.bf16.msra.mxu2 %v1968_v52  ;;  %869 = vmatpush.bf16.msra.mxu3 %v1972_v56  ;;  %v2160_v12 = vld [vmem:[#allocation7 + $0x54] sm:$0xf0]  ;;  %v2158_v13 = vld [vmem:[#allocation7 + $0x4c] sm:$0xf]  ;;  %v1937_v14 = vld [vmem:[#allocation7 + $0x58] sm:$0xf0]  ;;  %v1928_v16 = vor.u32 %v2159_v7, %v1927_v6  ;;  %v1932_v17 = vor.u32 %v2157_v8, %v1929_v10 }
  0x2a   :  { %145 = vadd.xlane.f32.xlu2 %v2548_v53  ;;  %v2554_v15 = vld [vmem:[#allocation2 + $0x38] sm:$0xff]  ;;  %v1936_v18 = vor.u32 %v2160_v12, %v1935_v11  ;;  %v1911_v19 = vld [vmem:[#allocation7 + $0x20] sm:$0xf]  ;;  %v2155_v20 = vld [vmem:[#allocation7 + $0x2c] sm:$0xf0]  ;;  %v1940_v22 = vor.u32 %v2158_v13, %v1937_v14 }
  0x2b   :  { %141 = vadd.xlane.f32.xlu0 %v2550_v63  ;;  %143 = vadd.xlane.f32.xlu1 %v2554_v15  ;;  %v2153_v21 = vld [vmem:[#allocation7 + $0x24] sm:$0xf]  ;;  %v1913_v23 = vld [vmem:[#allocation7 + $0x30] sm:$0xf0]  ;;  %v1919_v24 = vld [vmem:[#allocation7 + $0x28] sm:$0xf]  ;;  %v1912_v33 = vor.u32 %v2155_v20, %v1911_v19  ;;  %v513_v14 = vpack.c.bf16 %v2554_v15, %v2550_v63 }
  0x2c   :  { %723 = vmatpush.bf16.msra.mxu0 %v1944_v3  ;;  %772 = vmatpush.bf16.msra.mxu1 %v1948_v4  ;;  %v2156_v25 = vld [vmem:[#allocation7 + $0x34] sm:$0xf0]  ;;  %v2154_v30 = vld [vmem:[#allocation7 + $0x2c] sm:$0xf]  ;;  %v1921_v31 = vld [vmem:[#allocation7 + $0x38] sm:$0xf0]  ;;  %v1916_v35 = vor.u32 %v2153_v21, %v1913_v23  ;;  %v511_v4 = vpack.c.bf16 %v2541_v27, %v2532_v1 }
  0x2d   :  { %821 = vmatpush.bf16.msra.mxu2 %v1952_v5  ;;  %870 = vmatpush.bf16.msra.mxu3 %v1956_v9  ;;  %v2557_v28 = vld [vmem:[#allocation2 + $0x58] sm:$0xff]  ;;  %v2559_v32 = vld [vmem:[#allocation2 + $0x48] sm:$0xff]  ;;  %v1895_v34 = vld [vmem:[#allocation7] sm:$0xf]  ;;  %v1920_v36 = vor.u32 %v2156_v25, %v1919_v24  ;;  %v1924_v40 = vor.u32 %v2154_v30, %v1921_v31  ;;  %v512_v9 = vpack.c.bf16 %v2539_v26, %v2530_v0  ;;  %v2460_v20 = vmov 128.0  }
  0x2e   :  { %v2151_v37 = vld [vmem:[#allocation7 + $0xc] sm:$0xf0]  ;;  %v2149_v38 = vld [vmem:[#allocation7 + $0x4] sm:$0xf]  ;;  %v1897_v41 = vld [vmem:[#allocation7 + $0x10] sm:$0xf0]  ;;  %2231 = vrcp.f32 %v2460_v20 }
  0x2f   :  { %v2561_v39 = vld [vmem:[#allocation2 + $0x50] sm:$0xff]  ;;  %v1903_v42 = vld [vmem:[#allocation7 + $0x8] sm:$0xf]  ;;  %v2152_v43 = vld [vmem:[#allocation7 + $0x14] sm:$0xf0]  ;;  %v1896_v46 = vor.u32 %v2151_v37, %v1895_v34  ;;  %v1900_v47 = vor.u32 %v2149_v38, %v1897_v41 }
  0x30   :  { %724 = vmatpush.bf16.msra.mxu0 %v1928_v16  ;;  %773 = vmatpush.bf16.msra.mxu1 %v1932_v17  ;;  %v2150_v44 = vld [vmem:[#allocation7 + $0xc] sm:$0xf]  ;;  %v1905_v45 = vld [vmem:[#allocation7 + $0x18] sm:$0xf0]  ;;  %v1904_v48 = vor.u32 %v2152_v43, %v1903_v42  ;;  %v2203_v59 = vld [vmem:[#allocation10 + $0xb0] sm:$0xff] }
  0x31   :  { %822 = vmatpush.bf16.msra.mxu2 %v1936_v18  ;;  %871 = vmatpush.bf16.msra.mxu3 %v1940_v22  ;;  %v1908_v49 = vor.u32 %v2150_v44, %v1905_v45  ;;  %v2568_v51 = vld [vmem:[#allocation2 + $0x70] sm:$0xff]  ;;  %v2570_v52 = vld [vmem:[#allocation2 + $0x60] sm:$0xff]  ;;  %v2573_v54 = vld [vmem:[#allocation2 + $0x68] sm:$0xff]  ;;  %v514_v22 = vpack.c.bf16 %v2559_v32, %v2548_v53 }
  0x32   :  { %151 = vadd.xlane.f32.xlu2 %v2557_v28  ;;  %v2204_v55 = vld [vmem:[#allocation10 + $0xb8] sm:$0xff]  ;;  %v2187_v60 = vld [vmem:[#allocation10 + $0x30] sm:$0xff]  ;;  %v2202_v5 = vld [vmem:[#allocation10 + $0xa8] sm:$0xff] }
  0x33   :  { %147 = vadd.xlane.f32.xlu0 %v2559_v32  ;;  %149 = vadd.xlane.f32.xlu1 %v2561_v39  ;;  %v2188_v56 = vld [vmem:[#allocation10 + $0x38] sm:$0xff]  ;;  %v2211_v61 = vld [vmem:[#allocation10 + $0xf0] sm:$0xff]  ;;  %v2186_v6 = vld [vmem:[#allocation10 + $0x28] sm:$0xff] }
  0x34   :  { %725 = vmatpush.bf16.msra.mxu0 %v1912_v33  ;;  %774 = vmatpush.bf16.msra.mxu1 %v1916_v35  ;;  %v2212_v57 = vld [vmem:[#allocation10 + $0xf8] sm:$0xff]  ;;  %v2195_v3 = vld [vmem:[#allocation10 + $0x70] sm:$0xff]  ;;  %v2210_v7 = vld [vmem:[#allocation10 + $0xe8] sm:$0xff]  ;;  %v2232_v21 = vpop.eup %2231 }
  0x35   :  { %823 = vmatpush.bf16.msra.mxu2 %v1920_v36  ;;  %872 = vmatpush.bf16.msra.mxu3 %v1924_v40  ;;  %v2196_v58 = vld [vmem:[#allocation10 + $0x78] sm:$0xff]  ;;  %v2194_v8 = vld [vmem:[#allocation10 + $0x68] sm:$0xff]  ;;  %v2201_v10 = vld [vmem:[#allocation10 + $0xa0] sm:$0xff]  ;;  %v162_v23 = vmul.f32 128.0, %v2232_v21  ;;  %v515_v36 = vpack.c.bf16 %v2557_v28, %v2561_v39  ;;  %vm166_vm0 = vweird.f32 %v2232_v21 }
  0x36   :  { %v2577_v62 = vld [vmem:[#allocation2 + $0x78] sm:$0xff]  ;;  %v2185_v11 = vld [vmem:[#allocation10 + $0x20] sm:$0xff]  ;;  %v2198_v44 = vld [vmem:[#allocation10 + $0x88] sm:$0xff] }
  0x37   :  { %v2209_v12 = vld [vmem:[#allocation10 + $0xe0] sm:$0xff]  ;;  %v2200_v16 = vld [vmem:[#allocation10 + $0x98] sm:$0xff]  ;;  %v163_v24 = vsub.f32 1.0, %v162_v23  ;;  %v2199_v25 = vld [vmem:[#allocation10 + $0x90] sm:$0xff] }
  0x38   :  { %726 = vmatpush.bf16.msra.mxu0 %v1896_v46  ;;  %775 = vmatpush.bf16.msra.mxu1 %v1900_v47  ;;  %v2193_v13 = vld [vmem:[#allocation10 + $0x60] sm:$0xff]  ;;  %v2184_v17 = vld [vmem:[#allocation10 + $0x18] sm:$0xff]  ;;  %v2183_v30 = vld [vmem:[#allocation10 + $0x10] sm:$0xff] }
  0x39   :  { %824 = vmatpush.bf16.msra.mxu2 %v1904_v48  ;;  %873 = vmatpush.bf16.msra.mxu3 %v1908_v49  ;;  %v2208_v18 = vld [vmem:[#allocation10 + $0xd8] sm:$0xff]  ;;  %v2207_v31 = vld [vmem:[#allocation10 + $0xd0] sm:$0xff]  ;;  %v164_v34 = vmul.f32 %v2232_v21, %v163_v24  ;;  %v2182_v48 = vld [vmem:[#allocation10 + $0x8] sm:$0xff]  ;;  %v517_v24 = vpack.c.bf16 %v2577_v62, %v2568_v51 }
  0x3a   :  { %157 = vadd.xlane.f32.xlu2 %v2568_v51  ;;  %v2192_v19 = vld [vmem:[#allocation10 + $0x58] sm:$0xff]  ;;  %v2191_v33 = vld [vmem:[#allocation10 + $0x50] sm:$0xff]  ;;  %v2206_v49 = vld [vmem:[#allocation10 + $0xc8] sm:$0xff] }
  0x3b   :  { %153 = vadd.xlane.f32.xlu0 %v2570_v52  ;;  %727 = vmatmul.bf16.vlgmr.msra.gmra.mxu0 %v510_v50  ;;  %v165_v35 = vadd.f32 %v2232_v21, %v164_v34  ;;  %v2205_v20 = vld [vmem:[#allocation10 + $0xc0] sm:$0xff] }
  0x3c   :  { %776 = vmatmul.bf16.vlgmr.msra.gmra.mxu1 %v510_v50  ;;  %825 = vmatmul.bf16.vlgmr.msra.gmra.mxu2 %v510_v50 }
  0x3d   :  { %874 = vmatmul.bf16.vlgmr.msra.gmra.mxu3 %v510_v50  ;;  %155 = vadd.xlane.f32.xlu1 %v2573_v54  ;;  %v2590_v37 = vsel %vm166_vm0, %v2232_v21, %v165_v35  ;;  %v2190_v50 = vld [vmem:[#allocation10 + $0x48] sm:$0xff]  ;;  %v2189_v21 = vld [vmem:[#allocation10 + $0x40] sm:$0xff] }
  0x3e   :  { %1368 = vmatpush.bf16.msrb.mxu2 %v2204_v55  ;;  %1270 = vmatpush.bf16.msrb.mxu0 %v2188_v56  ;;  %3488 = vst [vmem:[#allocation16_spill] sm:$0xff] %v2590_v37 }
  0x3f   :  { %1417 = vmatpush.bf16.msrb.mxu3 %v2212_v57  ;;  %1319 = vmatpush.bf16.msrb.mxu1 %v2196_v58  ;;  %v516_v58 = vpack.c.bf16 %v2573_v54, %v2570_v52 }
  0x42   :  { %1369 = vmatpush.bf16.msrb.mxu2 %v2203_v59  ;;  %1271 = vmatpush.bf16.msrb.mxu0 %v2187_v60 }
  0x43   :  { %159 = vadd.xlane.f32.xlu0 %v2577_v62  ;;  %1418 = vmatpush.bf16.msrb.mxu3 %v2211_v61 }
  0x44   :  { %1320 = vmatpush.bf16.msrb.mxu1 %v2195_v3 }
  0x46   :  { %1370 = vmatpush.bf16.msrb.mxu2 %v2202_v5  ;;  %1272 = vmatpush.bf16.msrb.mxu0 %v2186_v6 }
  0x47   :  { %1419 = vmatpush.bf16.msrb.mxu3 %v2210_v7 }
  0x48   :  { %1321 = vmatpush.bf16.msrb.mxu1 %v2194_v8 }
  0x4a   :  { %1371 = vmatpush.bf16.msrb.mxu2 %v2201_v10  ;;  %1273 = vmatpush.bf16.msrb.mxu0 %v2185_v11  ;;  %v2197_v10 = vld [vmem:[#allocation10 + $0x80] sm:$0xff] }
  0x4b   :  { %732 = vmatmul.bf16.gmra.mxu0 %v511_v4  ;;  %1420 = vmatpush.bf16.msrb.mxu3 %v2209_v12 }
  0x4c   :  { %781 = vmatmul.bf16.gmra.mxu1 %v511_v4  ;;  %830 = vmatmul.bf16.gmra.mxu2 %v511_v4 }
  0x4d   :  { %879 = vmatmul.bf16.gmra.mxu3 %v511_v4  ;;  %1322 = vmatpush.bf16.msrb.mxu1 %v2193_v13 }
  0x4e   :  { %1372 = vmatpush.bf16.msrb.mxu2 %v2200_v16  ;;  %1274 = vmatpush.bf16.msrb.mxu0 %v2184_v17 }
  0x4f   :  { %1421 = vmatpush.bf16.msrb.mxu3 %v2208_v18 }
  0x51   :  { %1323 = vmatpush.bf16.msrb.mxu1 %v2192_v19  ;;  %v2181_v19 = vld [vmem:[#allocation10] sm:$0xff] }
  0x52   :  { %1373 = vmatpush.bf16.msrb.mxu2 %v2199_v25  ;;  %1275 = vmatpush.bf16.msrb.mxu0 %v2183_v30 }
  0x53   :  { %1422 = vmatpush.bf16.msrb.mxu3 %v2207_v31 }
  0x55   :  { %1324 = vmatpush.bf16.msrb.mxu1 %v2191_v33 }
  0x56   :  { %1374 = vmatpush.bf16.msrb.mxu2 %v2198_v44  ;;  %1276 = vmatpush.bf16.msrb.mxu0 %v2182_v48 }
  0x57   :  { %1423 = vmatpush.bf16.msrb.mxu3 %v2206_v49 }
  0x59   :  { %1325 = vmatpush.bf16.msrb.mxu1 %v2190_v50 }
  0x5a   :  { %1375 = vmatpush.bf16.msrb.mxu2 %v2197_v10  ;;  %1277 = vmatpush.bf16.msrb.mxu0 %v2181_v19 }
  0x5b   :  { %737 = vmatmul.bf16.gmra.mxu0 %v512_v9  ;;  %1424 = vmatpush.bf16.msrb.mxu3 %v2205_v20 }
  0x5c   :  { %786 = vmatmul.bf16.gmra.mxu1 %v512_v9  ;;  %835 = vmatmul.bf16.gmra.mxu2 %v512_v9 }
  0x5d   :  { %884 = vmatmul.bf16.gmra.mxu3 %v512_v9  ;;  %1326 = vmatpush.bf16.msrb.mxu1 %v2189_v21 }
  0x6b   :  { %742 = vmatmul.bf16.gmra.mxu0 %v513_v14 }
  0x6c   :  { %791 = vmatmul.bf16.gmra.mxu1 %v513_v14  ;;  %840 = vmatmul.bf16.gmra.mxu2 %v513_v14 }
  0x6d   :  { %889 = vmatmul.bf16.gmra.mxu3 %v513_v14 }
  0x7b   :  { %747 = vmatmul.bf16.gmra.mxu0 %v514_v22 }
  0x7c   :  { %796 = vmatmul.bf16.gmra.mxu1 %v514_v22  ;;  %845 = vmatmul.bf16.gmra.mxu2 %v514_v22 }
  0x7d   :  { %894 = vmatmul.bf16.gmra.mxu3 %v514_v22 }
  0x8b   :  { %752 = vmatmul.bf16.gmra.mxu0 %v515_v36  ;;  %v138_v38 = vpop.xlane.xlu2 %137  ;;  %v134_v40 = vpop.xlane.xlu1 %133 }
  0x8c   :  { %801 = vmatmul.bf16.gmra.mxu1 %v515_v36  ;;  %850 = vmatmul.bf16.gmra.mxu2 %v515_v36  ;;  %v170_v41 = vmul.f32 %v2590_v37, %v134_v40  ;;  %v130_v42 = vpop.xlane.xlu0 %129  ;;  %v172_v5 = vmul.f32 %v2590_v37, %v138_v38 }
  0x8d   :  { %899 = vmatmul.bf16.gmra.mxu3 %v515_v36  ;;  %v168_v43 = vmul.f32 %v2590_v37, %v130_v42 }
  0x8e   :  { %v2595_v45 = vsub.f32 %v2532_v1, %v170_v41 }
  0x8f   :  { %v2598_v46 = vsub.f32 %v2534_v2, %v168_v43 }
  0x90   :  { %v202_v47 = vmul.f32 %v2595_v45, %v2595_v45 }
  0x91   :  { %v200_v55 = vmul.f32 %v2598_v46, %v2598_v46 }
  0x92   :  { %220 = vadd.xlane.f32.xlu0 %v202_v47 }
  0x93   :  { %216 = vadd.xlane.f32.xlu1 %v200_v55  ;;  %v109_v55 = vld [vmem:[#allocation8] sm:$0xf] }
  0x94   :  { %v2699_v10 = vperm.slane %v109_v55, 2 }
  0x95   :  { %v140_v56 = vpop.xlane.xlu2 %139  ;;  %v136_v2 = vpop.xlane.xlu1 %135 }
  0x96   :  { %v173_v1 = vmul.f32 %v2590_v37, %v140_v56  ;;  %v132_v57 = vpop.xlane.xlu0 %131  ;;  %v171_v59 = vmul.f32 %v2590_v37, %v136_v2  ;;  %v2688_v2 = vperm.slane %v109_v55, 0 }
  0x97   :  { %v169_v60 = vmul.f32 %v2590_v37, %v132_v57 }
  0x98   :  { %v2610_v61 = vsub.f32 %v2539_v26, %v173_v1  ;;  %v2613_v3 = vsub.f32 %v2541_v27, %v171_v59  ;;  %v2626_v27 = vsub.f32 %v2530_v0, %v172_v5 }
  0x99   :  { %v2616_v4 = vsub.f32 %v2543_v29, %v169_v60 }
  0x9a   :  { %3489 = vst [vmem:[#allocation17_spill] sm:$0xff] %v2610_v61  ;;  %v205_v6 = vmul.f32 %v2610_v61, %v2610_v61  ;;  %v203_v7 = vmul.f32 %v2613_v3, %v2613_v3  ;;  %v204_v16 = vmul.f32 %v2626_v27, %v2626_v27 }
  0x9b   :  { %3490 = vst [vmem:[#allocation18_spill] sm:$0xff] %v2613_v3  ;;  %757 = vmatmul.bf16.gmra.mxu0 %v516_v58  ;;  %v201_v8 = vmul.f32 %v2616_v4, %v2616_v4 }
  0x9c   :  { %806 = vmatmul.bf16.gmra.mxu1 %v516_v58  ;;  %855 = vmatmul.bf16.gmra.mxu2 %v516_v58  ;;  %3491 = vst [vmem:[#allocation19_spill] sm:$0xff] %v2626_v27 }
  0x9d   :  { %904 = vmatmul.bf16.gmra.mxu3 %v516_v58  ;;  %226 = vadd.xlane.f32.xlu0 %v205_v6  ;;  %v146_v26 = vpop.xlane.xlu2 %145  ;;  %v2690_v58 = vperm.slane %v109_v55, 1 }
  0x9e   :  { %222 = vadd.xlane.f32.xlu1 %v203_v7  ;;  %218 = vadd.xlane.f32.xlu2 %v201_v8  ;;  %v176_v29 = vmul.f32 %v2590_v37, %v146_v26  ;;  %v142_v9 = vpop.xlane.xlu0 %141  ;;  %v144_v12 = vpop.xlane.xlu1 %143 }
  0x9f   :  { %v174_v11 = vmul.f32 %v2590_v37, %v142_v9  ;;  %v175_v17 = vmul.f32 %v2590_v37, %v144_v12  ;;  %v2702_v12 = vperm.slane %v109_v55, 3 }
  0xa0   :  { %v2631_v13 = vsub.f32 %v2548_v53, %v176_v29 }
  0xa1   :  { %v2634_v14 = vsub.f32 %v2550_v63, %v174_v11  ;;  %v2645_v22 = vsub.f32 %v2554_v15, %v175_v17 }
  0xa2   :  { %v208_v0 = vmul.f32 %v2631_v13, %v2631_v13 }
  0xa3   :  { %3492 = vst [vmem:[#allocation20_spill] sm:$0xff] %v2634_v14  ;;  %v206_v18 = vmul.f32 %v2634_v14, %v2634_v14  ;;  %v207_v15 = vmul.f32 %v2645_v22, %v2645_v22 }
  0xa4   :  { %3493 = vst [vmem:[#allocation21_spill] sm:$0xff] %v2645_v22 }
  0xa5   :  { %232 = vadd.xlane.f32.xlu0 %v208_v0  ;;  %v152_v53 = vpop.xlane.xlu2 %151 }
  0xa6   :  { %224 = vadd.xlane.f32.xlu2 %v204_v16  ;;  %228 = vadd.xlane.f32.xlu1 %v206_v18  ;;  %v179_v63 = vmul.f32 %v2590_v37, %v152_v53  ;;  %v148_v23 = vpop.xlane.xlu0 %147  ;;  %v150_v30 = vpop.xlane.xlu1 %149 }
  0xa7   :  { %v177_v25 = vmul.f32 %v2590_v37, %v148_v23  ;;  %v178_v35 = vmul.f32 %v2590_v37, %v150_v30 }
  0xa8   :  { %v2651_v31 = vsub.f32 %v2557_v28, %v179_v63 }
  0xa9   :  { %v2654_v33 = vsub.f32 %v2559_v32, %v177_v25  ;;  %v2665_v38 = vsub.f32 %v2561_v39, %v178_v35 }
  0xaa   :  { %v211_v34 = vmul.f32 %v2651_v31, %v2651_v31 }
  0xab   :  { %762 = vmatmul.bf16.gmra.mxu0 %v517_v24  ;;  %v209_v36 = vmul.f32 %v2654_v33, %v2654_v33  ;;  %v210_v48 = vmul.f32 %v2665_v38, %v2665_v38 }
  0xac   :  { %811 = vmatmul.bf16.gmra.mxu1 %v517_v24  ;;  %860 = vmatmul.bf16.gmra.mxu2 %v517_v24 }
  0xad   :  { %909 = vmatmul.bf16.gmra.mxu3 %v517_v24  ;;  %238 = vadd.xlane.f32.xlu0 %v211_v34  ;;  %v158_v28 = vpop.xlane.xlu2 %157 }
  0xae   :  { %230 = vadd.xlane.f32.xlu2 %v207_v15  ;;  %234 = vadd.xlane.f32.xlu1 %v209_v36  ;;  %v182_v32 = vmul.f32 %v2590_v37, %v158_v28  ;;  %v154_v40 = vpop.xlane.xlu0 %153 }
  0xaf   :  { %v180_v41 = vmul.f32 %v2590_v37, %v154_v40 }
  0xb0   :  { %v2669_v42 = vsub.f32 %v2568_v51, %v182_v32  ;;  %v156_v43 = vpop.xlane.xlu1 %155 }
  0xb1   :  { %v2672_v44 = vsub.f32 %v2570_v52, %v180_v41  ;;  %v181_v49 = vmul.f32 %v2590_v37, %v156_v43 }
  0xb2   :  { %3494 = vst [vmem:[#allocation22_spill] sm:$0xff] %v2669_v42  ;;  %v214_v47 = vmul.f32 %v2669_v42, %v2669_v42 }
  0xb3   :  { %v212_v39 = vmul.f32 %v2672_v44, %v2672_v44  ;;  %v2682_v51 = vsub.f32 %v2573_v54, %v181_v49 }
  0xb5   :  { %244 = vadd.xlane.f32.xlu0 %v214_v47  ;;  %v213_v59 = vmul.f32 %v2682_v51, %v2682_v51 }
  0xb6   :  { %236 = vadd.xlane.f32.xlu2 %v210_v48  ;;  %240 = vadd.xlane.f32.xlu1 %v212_v39  ;;  %v160_v50 = vpop.xlane.xlu0 %159 }
  0xb7   :  { %v183_v52 = vmul.f32 %v2590_v37, %v160_v50 }
  0xb8   :  { %v728_v56 = vpop.f32.mrf.mxu0 }
  0xb9   :  { %v2686_v1 = vsub.f32 %v2577_v62, %v183_v52  ;;  %v777_v57 = vpop.f32.mrf.mxu1  ;;  %v729_v60 = vadd.f32 %v728_v56, %v2688_v2 }
  0xba   :  { %v778_v5 = vadd.f32 %v777_v57, %v2690_v58 }
  0xbb   :  { %3495 = vst [vmem:[#allocation23_spill] sm:$0xff] %v2686_v1  ;;  %v215_v54 = vmul.f32 %v2686_v1, %v2686_v1  ;;  %v915_v8 = vmax.f32 %v729_v60, 0.0 }
  0xbc   :  { %v916_v9 = vmax.f32 %v778_v5, 0.0 }
  0xbe   :  { %242 = vadd.xlane.f32.xlu2 %v213_v59  ;;  %246 = vadd.xlane.f32.xlu1 %v215_v54 }
  0xbf   :  { %v826_v6 = vpop.f32.mrf.mxu2 }
  0xc0   :  { %v875_v62 = vpop.f32.mrf.mxu3  ;;  %v730_v7 = vpop.f32.mrf.mxu0  ;;  %v827_v18 = vadd.f32 %v826_v6, %v2699_v10 }
  0xc1   :  { %v731_v26 = vadd.f32 %v730_v7, %v2688_v2  ;;  %v779_v29 = vpop.f32.mrf.mxu1  ;;  %v876_v20 = vadd.f32 %v875_v62, %v2702_v12 }
  0xc2   :  { %v780_v11 = vadd.f32 %v779_v29, %v2690_v58  ;;  %v917_v30 = vmax.f32 %v827_v18, 0.0 }
  0xc3   :  { %v919_v0 = vmax.f32 %v731_v26, 0.0  ;;  %v918_v15 = vmax.f32 %v876_v20, 0.0 }
  0xc4   :  { %v920_v16 = vmax.f32 %v780_v11, 0.0 }
  0xc5   :  { %v979_v17 = vpack.c.bf16 %v919_v0, %v915_v8 }
  0xc6   :  { %v980_v19 = vpack.c.bf16 %v920_v16, %v916_v9 }
  0xc7   :  { %v828_v21 = vpop.f32.mrf.mxu2  ;;  %1278 = vmatmul.bf16.vlgmr.msrb.gmra.mxu0 %v979_v17 }
  0xc8   :  { %v829_v53 = vadd.f32 %v828_v21, %v2699_v10  ;;  %v877_v63 = vpop.f32.mrf.mxu3  ;;  %1327 = vmatmul.bf16.vlgmr.msrb.gmra.mxu1 %v980_v19  ;;  %v733_v23 = vpop.f32.mrf.mxu0 }
  0xc9   :  { %v878_v24 = vadd.f32 %v877_v63, %v2702_v12  ;;  %v782_v25 = vpop.f32.mrf.mxu1  ;;  %v734_v28 = vadd.f32 %v733_v23, %v2688_v2 }
  0xca   :  { %v921_v34 = vmax.f32 %v829_v53, 0.0  ;;  %v783_v40 = vadd.f32 %v782_v25, %v2690_v58 }
  0xcb   :  { %v922_v35 = vmax.f32 %v878_v24, 0.0  ;;  %v923_v48 = vmax.f32 %v734_v28, 0.0 }
  0xcc   :  { %v981_v36 = vpack.c.bf16 %v921_v34, %v917_v30  ;;  %v924_v50 = vmax.f32 %v783_v40, 0.0 }
  0xcd   :  { %v982_v32 = vpack.c.bf16 %v922_v35, %v918_v15 }
  0xce   :  { %1376 = vmatmul.bf16.vlgmr.msrb.gmra.mxu2 %v981_v36 }
  0xcf   :  { %1425 = vmatmul.bf16.vlgmr.msrb.gmra.mxu3 %v982_v32  ;;  %v831_v41 = vpop.f32.mrf.mxu2 }
  0xd0   :  { %v880_v43 = vpop.f32.mrf.mxu3  ;;  %v735_v47 = vpop.f32.mrf.mxu0  ;;  %v832_v59 = vadd.f32 %v831_v41, %v2699_v10 }
  0xd1   :  { %v736_v49 = vadd.f32 %v735_v47, %v2688_v2  ;;  %v784_v39 = vpop.f32.mrf.mxu1  ;;  %v881_v60 = vadd.f32 %v880_v43, %v2702_v12 }
  0xd2   :  { %v785_v52 = vadd.f32 %v784_v39, %v2690_v58  ;;  %v925_v29 = vmax.f32 %v832_v59, 0.0 }
  0xd3   :  { %v927_v55 = vmax.f32 %v736_v49, 0.0  ;;  %v926_v11 = vmax.f32 %v881_v60, 0.0 }
  0xd4   :  { %v928_v56 = vmax.f32 %v785_v52, 0.0 }
  0xd5   :  { %v983_v57 = vpack.c.bf16 %v927_v55, %v923_v48 }
  0xd6   :  { %v984_v54 = vpack.c.bf16 %v928_v56, %v924_v50 }
  0xd7   :  { %v833_v5 = vpop.f32.mrf.mxu2  ;;  %1283 = vmatmul.bf16.gmra.mxu0 %v983_v57 }
  0xd8   :  { %v834_v6 = vadd.f32 %v833_v5, %v2699_v10  ;;  %v882_v62 = vpop.f32.mrf.mxu3  ;;  %1332 = vmatmul.bf16.gmra.mxu1 %v984_v54  ;;  %v738_v7 = vpop.f32.mrf.mxu0 }
  0xd9   :  { %v883_v8 = vadd.f32 %v882_v62, %v2702_v12  ;;  %v787_v26 = vpop.f32.mrf.mxu1  ;;  %v739_v17 = vadd.f32 %v738_v7, %v2688_v2 }
  0xda   :  { %v929_v9 = vmax.f32 %v834_v6, 0.0  ;;  %v788_v19 = vadd.f32 %v787_v26, %v2690_v58 }
  0xdb   :  { %v930_v0 = vmax.f32 %v883_v8, 0.0  ;;  %v931_v63 = vmax.f32 %v739_v17, 0.0 }
  0xdc   :  { %v985_v16 = vpack.c.bf16 %v929_v9, %v925_v29  ;;  %v932_v25 = vmax.f32 %v788_v19, 0.0 }
  0xdd   :  { %v986_v18 = vpack.c.bf16 %v930_v0, %v926_v11 }
  0xde   :  { %1381 = vmatmul.bf16.gmra.mxu2 %v985_v16 }
  0xdf   :  { %1430 = vmatmul.bf16.gmra.mxu3 %v986_v18  ;;  %v836_v20 = vpop.f32.mrf.mxu2 }
  0xe0   :  { %v885_v21 = vpop.f32.mrf.mxu3  ;;  %v740_v53 = vpop.f32.mrf.mxu0  ;;  %v837_v36 = vadd.f32 %v836_v20, %v2699_v10 }
  0xe1   :  { %v741_v23 = vadd.f32 %v740_v53, %v2688_v2  ;;  %v789_v24 = vpop.f32.mrf.mxu1  ;;  %v886_v32 = vadd.f32 %v885_v21, %v2702_v12 }
  0xe2   :  { %v790_v30 = vadd.f32 %v789_v24, %v2690_v58  ;;  %v933_v39 = vmax.f32 %v837_v36, 0.0 }
  0xe3   :  { %v935_v34 = vmax.f32 %v741_v23, 0.0  ;;  %v934_v52 = vmax.f32 %v886_v32, 0.0 }
  0xe4   :  { %v936_v15 = vmax.f32 %v790_v30, 0.0 }
  0xe5   :  { %v987_v35 = vpack.c.bf16 %v935_v34, %v931_v63 }
  0xe6   :  { %v988_v28 = vpack.c.bf16 %v936_v15, %v932_v25 }
  0xe7   :  { %v838_v40 = vpop.f32.mrf.mxu2  ;;  %1288 = vmatmul.bf16.gmra.mxu0 %v987_v35 }
  0xe8   :  { %v839_v41 = vadd.f32 %v838_v40, %v2699_v10  ;;  %v887_v43 = vpop.f32.mrf.mxu3  ;;  %1337 = vmatmul.bf16.gmra.mxu1 %v988_v28  ;;  %v743_v47 = vpop.f32.mrf.mxu0 }
  0xe9   :  { %v888_v48 = vadd.f32 %v887_v43, %v2702_v12  ;;  %v792_v49 = vpop.f32.mrf.mxu1  ;;  %v744_v57 = vadd.f32 %v743_v47, %v2688_v2 }
  0xea   :  { %v937_v50 = vmax.f32 %v839_v41, 0.0  ;;  %v793_v54 = vadd.f32 %v792_v49, %v2690_v58 }
  0xeb   :  { %v938_v55 = vmax.f32 %v888_v48, 0.0  ;;  %v939_v62 = vmax.f32 %v744_v57, 0.0 }
  0xec   :  { %v989_v56 = vpack.c.bf16 %v937_v50, %v933_v39  ;;  %v940_v26 = vmax.f32 %v793_v54, 0.0 }
  0xed   :  { %v990_v59 = vpack.c.bf16 %v938_v55, %v934_v52 }
  0xee   :  { %1386 = vmatmul.bf16.gmra.mxu2 %v989_v56 }
  0xef   :  { %1435 = vmatmul.bf16.gmra.mxu3 %v990_v59  ;;  %v841_v60 = vpop.f32.mrf.mxu2 }
  0xf0   :  { %v890_v5 = vpop.f32.mrf.mxu3  ;;  %v745_v6 = vpop.f32.mrf.mxu0  ;;  %v842_v16 = vadd.f32 %v841_v60, %v2699_v10 }
  0xf1   :  { %v746_v7 = vadd.f32 %v745_v6, %v2688_v2  ;;  %v794_v8 = vpop.f32.mrf.mxu1  ;;  %v891_v18 = vadd.f32 %v890_v5, %v2702_v12 }
  0xf2   :  { %v795_v29 = vadd.f32 %v794_v8, %v2690_v58  ;;  %v941_v24 = vmax.f32 %v842_v16, 0.0 }
  0xf3   :  { %v943_v9 = vmax.f32 %v746_v7, 0.0  ;;  %v942_v30 = vmax.f32 %v891_v18, 0.0 }
  0xf4   :  { %v944_v11 = vmax.f32 %v795_v29, 0.0 }
  0xf5   :  { %v991_v0 = vpack.c.bf16 %v943_v9, %v939_v62 }
  0xf6   :  { %v992_v17 = vpack.c.bf16 %v944_v11, %v940_v26 }
  0xf7   :  { %v843_v19 = vpop.f32.mrf.mxu2  ;;  %1293 = vmatmul.bf16.gmra.mxu0 %v991_v0 }
  0xf8   :  { %v844_v20 = vadd.f32 %v843_v19, %v2699_v10  ;;  %v892_v21 = vpop.f32.mrf.mxu3  ;;  %1342 = vmatmul.bf16.gmra.mxu1 %v992_v17  ;;  %v748_v53 = vpop.f32.mrf.mxu0 }
  0xf9   :  { %v893_v63 = vadd.f32 %v892_v21, %v2702_v12  ;;  %v797_v23 = vpop.f32.mrf.mxu1  ;;  %v749_v35 = vadd.f32 %v748_v53, %v2688_v2 }
  0xfa   :  { %v945_v25 = vmax.f32 %v844_v20, 0.0  ;;  %v798_v28 = vadd.f32 %v797_v23, %v2690_v58 }
  0xfb   :  { %v946_v34 = vmax.f32 %v893_v63, 0.0  ;;  %v947_v43 = vmax.f32 %v749_v35, 0.0 }
  0xfc   :  { %v993_v15 = vpack.c.bf16 %v945_v25, %v941_v24  ;;  %v948_v49 = vmax.f32 %v798_v28, 0.0 }
  0xfd   :  { %v994_v36 = vpack.c.bf16 %v946_v34, %v942_v30 }
  0xfe   :  { %1391 = vmatmul.bf16.gmra.mxu2 %v993_v15 }
  0xff   :  { %1440 = vmatmul.bf16.gmra.mxu3 %v994_v36  ;;  %v846_v32 = vpop.f32.mrf.mxu2 }
 0x100   :  { %v895_v40 = vpop.f32.mrf.mxu3  ;;  %v750_v41 = vpop.f32.mrf.mxu0  ;;  %v847_v56 = vadd.f32 %v846_v32, %v2699_v10 }
 0x101   :  { %v751_v47 = vadd.f32 %v750_v41, %v2688_v2  ;;  %v799_v48 = vpop.f32.mrf.mxu1  ;;  %v896_v54 = vadd.f32 %v895_v40, %v2702_v12 }
 0x102   :  { %v800_v39 = vadd.f32 %v799_v48, %v2690_v58  ;;  %v949_v29 = vmax.f32 %v847_v56, 0.0 }
 0x103   :  { %v951_v50 = vmax.f32 %v751_v47, 0.0  ;;  %v950_v11 = vmax.f32 %v896_v54, 0.0 }
 0x104   :  { %v952_v52 = vmax.f32 %v800_v39, 0.0 }
 0x105   :  { %v995_v55 = vpack.c.bf16 %v951_v50, %v947_v43  ;;  %v221_v59 = vpop.xlane.xlu0 %220 }
 0x106   :  { %v996_v57 = vpack.c.bf16 %v952_v52, %v948_v49  ;;  %v217_v5 = vpop.xlane.xlu1 %216  ;;  %v250_v16 = vmul.f32 %v221_v59, %v2590_v37 }
 0x107   :  { %v848_v60 = vpop.f32.mrf.mxu2  ;;  %1298 = vmatmul.bf16.gmra.mxu0 %v995_v55  ;;  %v248_v19 = vmul.f32 %v217_v5, %v2590_v37 }
 0x108   :  { %v849_v6 = vadd.f32 %v848_v60, %v2699_v10  ;;  %v897_v62 = vpop.f32.mrf.mxu3  ;;  %1347 = vmatmul.bf16.gmra.mxu1 %v996_v57  ;;  %v753_v7 = vpop.f32.mrf.mxu0  ;;  %v2742_v20 = vadd.f32 1e-05, %v250_v16 }
 0x109   :  { %v898_v8 = vadd.f32 %v897_v62, %v2702_v12  ;;  %v802_v26 = vpop.f32.mrf.mxu1  ;;  %v2744_v23 = vadd.f32 1e-05, %v248_v19  ;;  %v754_v24 = vadd.f32 %v753_v7, %v2688_v2 }
 0x10a   :  { %v953_v9 = vmax.f32 %v849_v6, 0.0  ;;  %v803_v34 = vadd.f32 %v802_v26, %v2690_v58  ;;  %2233 = vrsqrt.f32 %v2742_v20  ;;  %vm306_vm1 = vweird.f32 %v2742_v20 }
 0x10b   :  { %v954_v0 = vmax.f32 %v898_v8, 0.0  ;;  %2235 = vrsqrt.f32 %v2744_v23  ;;  %v955_v28 = vmax.f32 %v754_v24, 0.0  ;;  %vm286_vm3 = vweird.f32 %v2744_v23 }
 0x10c   :  { %v997_v17 = vpack.c.bf16 %v953_v9, %v949_v29  ;;  %v956_v40 = vmax.f32 %v803_v34, 0.0 }
 0x10d   :  { %v998_v18 = vpack.c.bf16 %v954_v0, %v950_v11 }
 0x10e   :  { %1396 = vmatmul.bf16.gmra.mxu2 %v997_v17 }
 0x10f   :  { %1445 = vmatmul.bf16.gmra.mxu3 %v998_v18  ;;  %v851_v21 = vpop.f32.mrf.mxu2 }
 0x110   :  { %v900_v53 = vpop.f32.mrf.mxu3  ;;  %v227_v63 = vpop.xlane.xlu0 %226  ;;  %v852_v41 = vadd.f32 %v851_v21, %v2699_v10 }
 0x111   :  { %v223_v25 = vpop.xlane.xlu1 %222  ;;  %v219_v30 = vpop.xlane.xlu2 %218  ;;  %v901_v43 = vadd.f32 %v900_v53, %v2702_v12 }
 0x112   :  { %v755_v15 = vpop.f32.mrf.mxu0  ;;  %v804_v35 = vpop.f32.mrf.mxu1  ;;  %v251_v49 = vmul.f32 %v223_v25, %v2590_v37  ;;  %v957_v60 = vmax.f32 %v852_v41, 0.0  ;;  %v249_v5 = vmul.f32 %v219_v30, %v2590_v37  ;;  %v253_v25 = vmul.f32 %v227_v63, %v2590_v37 }
 0x113   :  { %v756_v36 = vadd.f32 %v755_v15, %v2688_v2  ;;  %v805_v32 = vadd.f32 %v804_v35, %v2690_v58  ;;  %v2756_v55 = vpop.eup %2233  ;;  %v958_v26 = vmax.f32 %v901_v43, 0.0 }
 0x114   :  { %v2760_v8 = vpop.eup %2235  ;;  %v301_v11 = vmul.f32 %v2756_v55, %v2742_v20  ;;  %v2764_v0 = vadd.f32 1e-05, %v251_v49  ;;  %v2768_v21 = vadd.f32 1e-05, %v249_v5  ;;  %vm307_vm2 = vweird.f32 %v2756_v55 }
 0x115   :  { %v959_v47 = vmax.f32 %v756_v36, 0.0  ;;  %v960_v39 = vmax.f32 %v805_v32, 0.0  ;;  %v281_v19 = vmul.f32 %v2760_v8, %v2744_v23  ;;  %vm287_vm4 = vweird.f32 %v2760_v8  ;;  %vm2840_vm5 = vmor %vm306_vm1, %vm307_vm2 }
 0x116   :  { %v302_v24 = vmul.f32 %v2756_v55, %v301_v11  ;;  %2237 = vrsqrt.f32 %v2764_v0  ;;  %vm2854_vm6 = vmor %vm286_vm3, %vm287_vm4  ;;  %vm316_vm7 = vweird.f32 %v2764_v0  ;;  %vm296_vm8 = vweird.f32 %v2768_v21 }
 0x117   :  { %v853_v48 = vpop.f32.mrf.mxu2  ;;  %v999_v56 = vpack.c.bf16 %v959_v47, %v955_v28  ;;  %v1000_v6 = vpack.c.bf16 %v960_v39, %v956_v40  ;;  %v282_v34 = vmul.f32 %v2760_v8, %v281_v19  ;;  %2239 = vrsqrt.f32 %v2768_v21 }
 0x118   :  { %v854_v50 = vadd.f32 %v853_v48, %v2699_v10  ;;  %v902_v52 = vpop.f32.mrf.mxu3  ;;  %v233_v9 = vpop.xlane.xlu0 %232  ;;  %v303_v36 = vmul.f32 0.5, %v302_v24  ;;  %v2777_v28 = vadd.f32 1e-05, %v253_v25 }
 0x119   :  { %v903_v57 = vadd.f32 %v902_v52, %v2702_v12  ;;  %v225_v59 = vpop.xlane.xlu2 %224  ;;  %v229_v54 = vpop.xlane.xlu1 %228  ;;  %1303 = vmatmul.bf16.gmra.mxu0 %v999_v56  ;;  %1352 = vmatmul.bf16.gmra.mxu1 %v1000_v6  ;;  %v256_v40 = vmul.f32 %v233_v9, %v2590_v37  ;;  %v283_v47 = vmul.f32 0.5, %v282_v34 }
 0x11a   :  { %v961_v62 = vmax.f32 %v854_v50, 0.0  ;;  %v758_v7 = vpop.f32.mrf.mxu0  ;;  %v807_v17 = vpop.f32.mrf.mxu1  ;;  %3496 = vst [vmem:[#allocation24_spill] sm:$0xff] %v2777_v28  ;;  %v252_v63 = vmul.f32 %v225_v59, %v2590_v37  ;;  %v304_v56 = vsub.f32 1.5, %v303_v36  ;;  %2241 = vrsqrt.f32 %v2777_v28 }
 0x11b   :  { %v962_v29 = vmax.f32 %v903_v57, 0.0  ;;  %v759_v39 = vadd.f32 %v758_v7, %v2688_v2  ;;  %v2794_v59 = vadd.f32 1e-05, %v256_v40 }
 0x11c   :  { %v1001_v16 = vpack.c.bf16 %v961_v62, %v957_v60  ;;  %v2780_v43 = vpop.eup %2237  ;;  %v808_v60 = vadd.f32 %v807_v17, %v2690_v58  ;;  %v284_v62 = vsub.f32 1.5, %v283_v47  ;;  %v2798_v7 = vadd.f32 1e-05, %v252_v63 }
 0x11d   :  { %v1002_v18 = vpack.c.bf16 %v962_v29, %v958_v26  ;;  %3497 = vst [vmem:[#allocation25_spill] sm:$0xff] %v2780_v43  ;;  %v2785_v52 = vpop.eup %2239  ;;  %v311_v57 = vmul.f32 %v2780_v43, %v2764_v0  ;;  %v254_v26 = vmul.f32 %v229_v54, %v2590_v37  ;;  %v963_v11 = vmax.f32 %v759_v39, 0.0 }
 0x11e   :  { %1401 = vmatmul.bf16.gmra.mxu2 %v1001_v16  ;;  %v291_v9 = vmul.f32 %v2785_v52, %v2768_v21  ;;  %2243 = vrsqrt.f32 %v2794_v59  ;;  %v2819_v63 = vmul.f32 %v2756_v55, %v304_v56  ;;  %vm317_vm9 = vweird.f32 %v2780_v43 }
 0x11f   :  { %1450 = vmatmul.bf16.gmra.mxu3 %v1002_v18  ;;  %v856_v53 = vpop.f32.mrf.mxu2  ;;  %v312_v54 = vmul.f32 %v2780_v43, %v311_v57  ;;  %vm297_vm10 = vweird.f32 %v2785_v52  ;;  %vm2908_vm11 = vmor %vm316_vm7, %vm317_vm9  ;;  %vm366_vm12 = vweird.f32 %v2794_v59 }
 0x120   :  { %v905_v30 = vpop.f32.mrf.mxu3  ;;  %v239_v41 = vpop.xlane.xlu0 %238  ;;  %v857_v16 = vadd.f32 %v856_v53, %v2699_v10  ;;  %vm2948_vm13 = vmor %vm296_vm8, %vm297_vm10 }
 0x121   :  { %v2775_v15 = vpop.xlane.xlu2 %230  ;;  %v235_v35 = vpop.xlane.xlu1 %234  ;;  %v259_v5 = vmul.f32 %v239_v41, %v2590_v37  ;;  %v906_v17 = vadd.f32 %v905_v30, %v2702_v12 }
 0x122   :  { %v760_v32 = vpop.f32.mrf.mxu0  ;;  %v257_v48 = vmul.f32 %v235_v35, %v2590_v37  ;;  %v809_v49 = vpop.f32.mrf.mxu1  ;;  %v964_v35 = vmax.f32 %v808_v60, 0.0  ;;  %v965_v57 = vmax.f32 %v857_v16, 0.0 }
 0x123   :  { %v761_v18 = vadd.f32 %v760_v32, %v2688_v2  ;;  %v810_v19 = vadd.f32 %v809_v49, %v2690_v58  ;;  %v2813_v36 = vadd.f32 1e-05, %v259_v5  ;;  %v2815_v53 = vpop.eup %2241  ;;  %v966_v60 = vmax.f32 %v906_v17, 0.0 }
 0x124   :  { %v2801_v29 = vadd.f32 1e-05, %v257_v48  ;;  %3498 = vst [vmem:[#allocation26_spill] sm:$0xff] %v2815_v53  ;;  %v292_v48 = vmul.f32 %v2785_v52, %v291_v9  ;;  %v2830_v9 = vmul.f32 %v2760_v8, %v284_v62  ;;  %v2834_v16 = vpop.eup %2243 }
 0x125   :  { %v967_v30 = vmax.f32 %v761_v18, 0.0  ;;  %v968_v32 = vmax.f32 %v810_v19, 0.0  ;;  %v313_v18 = vmul.f32 0.5, %v312_v54  ;;  %v331_v19 = vmul.f32 %v2815_v53, %v2777_v28 }
 0x126   :  { %2245 = vrsqrt.f32 %v2801_v29  ;;  %v293_v17 = vmul.f32 0.5, %v292_v48  ;;  %vm367_vm14 = vweird.f32 %v2834_v16  ;;  %vm376_vm15 = vweird.f32 %v2801_v29 }
 0x127   :  { %v858_v50 = vpop.f32.mrf.mxu2  ;;  %2247 = vrsqrt.f32 %v2798_v7  ;;  %v1003_v5 = vpack.c.bf16 %v967_v30, %v963_v11  ;;  %v1004_v56 = vpack.c.bf16 %v968_v32, %v964_v35  ;;  %v314_v30 = vsub.f32 1.5, %v313_v18  ;;  %vm2992_vm3 = vmor %vm366_vm12, %vm367_vm14 }
 0x128   :  { %v907_v6 = vpop.f32.mrf.mxu3  ;;  %v859_v24 = vadd.f32 %v858_v50, %v2699_v10  ;;  %v245_v50 = vpop.xlane.xlu0 %244  ;;  %2249 = vrsqrt.f32 %v2813_v36  ;;  %vm396_vm0 = vweird.f32 %v2813_v36 }
 0x129   :  { %v908_v25 = vadd.f32 %v907_v6, %v2702_v12  ;;  %v237_v34 = vpop.xlane.xlu2 %236  ;;  %v241_v40 = vpop.xlane.xlu1 %240  ;;  %1308 = vmatmul.bf16.gmra.mxu0 %v1003_v5  ;;  %1357 = vmatmul.bf16.gmra.mxu1 %v1004_v56 }
 0x12a   :  { %v969_v41 = vmax.f32 %v859_v24, 0.0  ;;  %v763_v47 = vpop.f32.mrf.mxu0  ;;  %v258_v39 = vmul.f32 %v237_v34, %v2590_v37  ;;  %v812_v6 = vpop.f32.mrf.mxu1  ;;  %v2832_v24 = vadd.f32 1e-05, %v254_v26  ;;  %v260_v62 = vmul.f32 %v241_v40, %v2590_v37 }
 0x12b   :  { %v970_v49 = vmax.f32 %v908_v25, 0.0  ;;  %v262_v26 = vmul.f32 %v245_v50, %v2590_v37  ;;  %v332_v40 = vmul.f32 %v2815_v53, %v331_v19  ;;  %v764_v56 = vadd.f32 %v763_v47, %v2688_v2 }
 0x12c   :  { %v1005_v25 = vpack.c.bf16 %v969_v41, %v965_v57  ;;  %v2844_v54 = vadd.f32 1e-05, %v258_v39  ;;  %v2848_v35 = vpop.eup %2245  ;;  %v2862_v32 = vadd.f32 1e-05, %v260_v62 }
 0x12d   :  { %v1006_v34 = vpack.c.bf16 %v970_v49, %v966_v60  ;;  %v2864_v48 = vpop.eup %2247  ;;  %v361_v49 = vmul.f32 %v2834_v16, %v2794_v59  ;;  %v2873_v39 = vadd.f32 1e-05, %v262_v26  ;;  %v294_v60 = vsub.f32 1.5, %v293_v17 }
 0x12e   :  { %1406 = vmatmul.bf16.gmra.mxu2 %v1005_v25  ;;  %2251 = vrsqrt.f32 %v2844_v54  ;;  %v2875_v50 = vpop.eup %2249  ;;  %v371_v5 = vmul.f32 %v2848_v35, %v2801_v29  ;;  %v2891_v17 = vmul.f32 0.5, %v332_v40  ;;  %v321_v62 = vmul.f32 %v2864_v48, %v2798_v7 }
 0x12f   :  { %v2824_v22 = vpop.f32.mrf.mxu2  ;;  %1455 = vmatmul.bf16.gmra.mxu3 %v1006_v34  ;;  %2253 = vrsqrt.f32 %v2832_v24  ;;  %v2889_v34 = vmul.f32 %v2780_v43, %v314_v30  ;;  %v255_v26 = vmul.f32 %v2775_v15, %v2590_v37  ;;  %v362_v23 = vmul.f32 %v2834_v16, %v361_v49 }
 0x130   :  { %v910_v41 = vpop.f32.mrf.mxu3  ;;  %2255 = vrsqrt.f32 %v2862_v32  ;;  %3504 = vst [vmem:[#allocation28_spill] sm:$0xff] %v2891_v17  ;;  %v391_v57 = vmul.f32 %v2875_v50, %v2813_v36  ;;  %v3505_v40 = vmov 0  ;;  %v2913_v15 = vmul.f32 %v2785_v52, %v294_v60 }
 0x131   :  { %v243_v18 = vpop.xlane.xlu2 %242  ;;  %v247_v19 = vpop.xlane.xlu1 %246  ;;  %2257 = vrsqrt.f32 %v2873_v39  ;;  %3503 = vst [vmem:[#allocation27_spill] sm:$0xff] %v2889_v34  ;;  %v3506_v40 = vsel %vm2908_vm11, 4294967295, %v3505_v40  ;;  %v372_v49 = vmul.f32 %v2848_v35, %v371_v5  ;;  %v971_v28 = vmax.f32 %v764_v56, 0.0 }
 0x132   :  { %v765_v25 = vpop.f32.mrf.mxu0  ;;  %v261_v14 = vmul.f32 %v243_v18, %v2590_v37  ;;  %v263_v47 = vmul.f32 %v247_v19, %v2590_v37  ;;  %v814_v61 = vpop.f32.mrf.mxu1  ;;  %3507 = vst [vmem:[#allocation29_spill] sm:$0xff] %v3506_v40  ;;  %v813_v18 = vadd.f32 %v812_v6, %v2690_v58  ;;  %v862_v0 = vadd.f32 %v2824_v22, %v2699_v10 }
 0x133   :  { %v766_v19 = vadd.f32 %v765_v25, %v2688_v2  ;;  %v815_v2 = vadd.f32 %v814_v61, %v2690_v58  ;;  %v2939_v56 = vadd.f32 1e-05, %v255_v26  ;;  %v392_v3 = vmul.f32 %v2875_v50, %v391_v57  ;;  %v3000_v58 = vld [vmem:[%s3469_s6] ss:$0 sm:$0xff] }
 0x134   :  { %v2902_v27 = vpop.eup %2251  ;;  %v2924_v17 = vadd.f32 1e-05, %v261_v14  ;;  %v2929_v60 = vadd.f32 1e-05, %v263_v47  ;;  %v363_v14 = vmul.f32 0.5, %v362_v23  ;;  %v373_v42 = vmul.f32 0.5, %v372_v49 }
 0x135   :  { %v2918_v37 = vpop.eup %2253  ;;  %v381_v53 = vmul.f32 %v2902_v27, %v2844_v54  ;;  %v975_v6 = vmax.f32 %v766_v19, 0.0  ;;  %v972_v47 = vmax.f32 %v813_v18, 0.0  ;;  %v911_v19 = vadd.f32 %v910_v41, %v2702_v12 }
 0x136   :  { %v2926_v1 = vpop.eup %2255  ;;  %2259 = vrsqrt.f32 %v2924_v17  ;;  %v973_v57 = vmax.f32 %v862_v0, 0.0  ;;  %v322_v21 = vmul.f32 %v2864_v48, %v321_v62  ;;  %v364_v18 = vsub.f32 1.5, %v363_v14  ;;  %v2972_v62 = vld [vmem:[#allocation5] ss:$0 sm:$0xff] }
 0x137   :  { %v863_v30 = vpop.f32.mrf.mxu2  ;;  %v2933_v25 = vpop.eup %2257  ;;  %v401_v23 = vmul.f32 %v2926_v1, %v2862_v32  ;;  %2261 = vrsqrt.f32 %v2929_v60  ;;  %v1007_v26 = vpack.c.bf16 %v975_v6, %v971_v28  ;;  %v393_v22 = vmul.f32 0.5, %v392_v3 }
 0x138   :  { %v864_v5 = vadd.f32 %v863_v30, %v2699_v10  ;;  %v912_v61 = vpop.f32.mrf.mxu3  ;;  %v382_v10 = vmul.f32 %v2902_v27, %v381_v53  ;;  %v421_v41 = vmul.f32 %v2933_v25, %v2873_v39  ;;  %v976_v30 = vmax.f32 %v815_v2, 0.0 }
 0x139   :  { %v913_v34 = vadd.f32 %v912_v61, %v2702_v12  ;;  %v299_v53 = vsel %vm2948_vm13, %v2785_v52, %v2913_v15  ;;  %1313 = vmatmul.bf16.gmra.mxu0 %v1007_v26  ;;  %v402_v28 = vmul.f32 %v2926_v1, %v401_v23  ;;  %v3510_v3 = vsel %vm2854_vm6, %v2760_v8, %v2830_v9  ;;  %v3006_v23 = vld [vmem:[%s3465_s2] ss:$0 sm:$0xff] }
 0x13a   :  { %v977_v49 = vmax.f32 %v864_v5, 0.0  ;;  %v1008_v0 = vpack.c.bf16 %v976_v30, %v972_v47  ;;  %v383_v40 = vmul.f32 0.5, %v382_v10  ;;  %v440_v12 = vmul.f32 %v3510_v3, %v2598_v46 }
 0x13b   :  { %v978_v6 = vmax.f32 %v913_v34, 0.0  ;;  %v374_v15 = vsub.f32 1.5, %v373_v42  ;;  %v422_v5 = vmul.f32 %v2933_v25, %v421_v41  ;;  %v974_v14 = vmax.f32 %v911_v19, 0.0 }
 0x13c   :  { %v1009_v43 = vpack.c.bf16 %v977_v49, %v973_v57  ;;  %v2974_v52 = vpop.eup %2259  ;;  %1362 = vmatmul.bf16.gmra.mxu1 %v1008_v0  ;;  %v365_v20 = vmul.f32 %v2834_v16, %v364_v18  ;;  %v394_v61 = vsub.f32 1.5, %v393_v22  ;;  %vm377_vm1 = vweird.f32 %v2848_v35 }
 0x13d   :  { %v2978_v47 = vpop.eup %2261  ;;  %v411_v46 = vmul.f32 %v2974_v52, %v2924_v17  ;;  %vm397_vm2 = vweird.f32 %v2875_v50  ;;  %v1010_v8 = vpack.c.bf16 %v978_v6, %v974_v14  ;;  %v384_v9 = vsub.f32 1.5, %v383_v40  ;;  %vm3015_vm6 = vmor %vm376_vm15, %vm377_vm1 }
 0x13e   :  { %1411 = vmatmul.bf16.gmra.mxu2 %v1009_v43  ;;  %v431_v42 = vmul.f32 %v2978_v47, %v2929_v60  ;;  %v403_v22 = vmul.f32 0.5, %v402_v28  ;;  %v459_v10 = vmul.f32 %v2972_v62, %v440_v12  ;;  %v375_v59 = vmul.f32 %v2848_v35, %v374_v15  ;;  %vm3031_vm8 = vmor %vm396_vm0, %vm397_vm2 }
 0x13f   :  { %v412_v19 = vmul.f32 %v2974_v52, %v411_v46  ;;  %vm386_vm4 = vweird.f32 %v2844_v54  ;;  %v423_v40 = vmul.f32 0.5, %v422_v5  ;;  %1460 = vmatmul.bf16.gmra.mxu3 %v1010_v8  ;;  %v395_v26 = vmul.f32 %v2875_v50, %v394_v61 }
 0x140   :  { %v432_v57 = vmul.f32 %v2978_v47, %v431_v42  ;;  %vm387_vm7 = vweird.f32 %v2902_v27  ;;  %v441_v49 = vmul.f32 %v299_v53, %v2616_v4  ;;  %v3022_v18 = vmul.f32 0.5, %v322_v21 }
 0x141   :  { %v413_v30 = vmul.f32 0.5, %v412_v19  ;;  %v369_v0 = vsel %vm2992_vm3, %v2834_v16, %v365_v20  ;;  %vm406_vm9 = vweird.f32 %v2862_v32  ;;  %v385_v6 = vmul.f32 %v2902_v27, %v384_v9  ;;  %vm3041_vm10 = vmor %vm386_vm4, %vm387_vm7 }
 0x142   :  { %v433_v28 = vmul.f32 0.5, %v432_v57  ;;  %v404_v4 = vsub.f32 1.5, %v403_v22  ;;  %v478_v3 = vadd.f32 %v3006_v23, %v459_v10  ;;  %vm407_vm12 = vweird.f32 %v2926_v1 }
 0x143   :  { %v424_v36 = vsub.f32 1.5, %v423_v40  ;;  %vm426_vm13 = vweird.f32 %v2873_v39  ;;  %v414_v12 = vsub.f32 1.5, %v413_v30  ;;  %v399_v5 = vsel %vm3031_vm8, %v2875_v50, %v395_v26  ;;  %vm3066_vm2 = vmor %vm406_vm9, %vm407_vm12 }
 0x144   :  { %v1279_v2 = vpop.f32.mrf.mxu0  ;;  %vm427_vm14 = vweird.f32 %v2933_v25  ;;  %v460_v54 = vmul.f32 %v2972_v62, %v441_v49  ;;  %vm416_vm15 = vweird.f32 %v2924_v17  ;;  %vm417_vm0 = vweird.f32 %v2974_v52 }
 0x145   :  { %v1328_v34 = vpop.f32.mrf.mxu1  ;;  %v1280_v21 = vadd.f32 %v3000_v58, %v1279_v2  ;;  %v379_v2 = vsel %vm3015_vm6, %v2848_v35, %v375_v59  ;;  %v434_v14 = vsub.f32 1.5, %v433_v28  ;;  %vm436_vm1 = vweird.f32 %v2929_v60  ;;  %vm3074_vm4 = vmor %vm426_vm13, %vm427_vm14 }
 0x146   :  { %v389_v20 = vsel %vm3041_vm10, %v2902_v27, %v385_v6  ;;  %v405_v35 = vmul.f32 %v2926_v1, %v404_v4  ;;  %v494_v46 = vmul.f32 4.0, %v478_v3  ;;  %vm326_vm3 = vweird.f32 %v2798_v7  ;;  %vm3086_vm7 = vmor %vm416_vm15, %vm417_vm0 }
 0x147   :  { %v1329_v61 = vadd.f32 %v1328_v34, %v1280_v21  ;;  %v425_v42 = vmul.f32 %v2933_v25, %v424_v36  ;;  %v415_v8 = vmul.f32 %v2974_v52, %v414_v12  ;;  %vm437_vm6 = vweird.f32 %v2978_v47  ;;  %v3528_v36 = vld [vmem:[#allocation22_spill] sm:$0xff] }
 0x148   :  { %v448_v43 = vmul.f32 %v369_v0, %v2631_v13  ;;  %v324_v34 = vsub.f32 1.5, %v3022_v18  ;;  %v479_v19 = vadd.f32 %v3006_v23, %v460_v54  ;;  %v3525_v13 = vsel %vm2840_vm5, %v2756_v55, %v2819_v63  ;;  %vm3103_vm8 = vmor %vm436_vm1, %vm437_vm6  ;;  %v3529_v54 = vld [vmem:[#allocation18_spill] sm:$0xff] }
 0x149   :  { %v442_v10 = vmul.f32 %v3525_v13, %v2595_v45  ;;  %v435_v59 = vmul.f32 %v2978_v47, %v434_v14  ;;  %v449_v57 = vmul.f32 %v379_v2, %v2654_v33  ;;  %v1466_v30 = vmul.f32 2.0, %v494_v46 }
 0x14a   :  { %v467_v17 = vmul.f32 %v2972_v62, %v448_v43  ;;  %v450_v55 = vmul.f32 %v389_v20, %v2665_v38  ;;  %v451_v45 = vmul.f32 %v399_v5, %v2651_v31  ;;  %v409_v63 = vsel %vm3066_vm2, %v2926_v1, %v405_v35  ;;  %v3532_v20 = vld [vmem:[#allocation27_spill] sm:$0xff] }
 0x14b   :  { %v429_v33 = vsel %vm3074_vm4, %v2933_v25, %v425_v42  ;;  %v419_v60 = vsel %vm3086_vm7, %v2974_v52, %v415_v8  ;;  %v468_v31 = vmul.f32 %v2972_v62, %v449_v57  ;;  %v439_v25 = vsel %vm3103_vm8, %v2978_v47, %v435_v59  ;;  %v3534_v42 = vld [vmem:[#allocation23_spill] sm:$0xff] }
 0x14c   :  { %v1281_v53 = vpop.f32.mrf.mxu0  ;;  %v3119_v18 = vadd.f32 %v3006_v23, %v467_v17  ;;  %v469_v38 = vmul.f32 %v2972_v62, %v450_v55  ;;  %v470_v1 = vmul.f32 %v2972_v62, %v451_v45  ;;  %v495_v28 = vmul.f32 4.0, %v479_v19 }
 0x14d   :  { %v1330_v15 = vpop.f32.mrf.mxu1  ;;  %v1282_v40 = vadd.f32 %v3000_v58, %v1281_v53  ;;  %v461_v52 = vmul.f32 %v2972_v62, %v442_v10  ;;  %v3132_v6 = vadd.f32 %v3006_v23, %v468_v31  ;;  %v452_v53 = vmul.f32 %v409_v63, %v2672_v44  ;;  %v3531_v44 = vld [vmem:[#allocation25_spill] sm:$0xff] }
 0x14e   :  { %v3135_v4 = vadd.f32 %v3006_v23, %v469_v38  ;;  %v3138_v21 = vadd.f32 %v3006_v23, %v470_v1  ;;  %vm327_vm5 = vweird.f32 %v2864_v48  ;;  %v341_v47 = vmul.f32 %v2918_v37, %v2832_v24 }
 0x14f   :  { %v1331_v29 = vadd.f32 %v1330_v15, %v1282_v40  ;;  %v453_v16 = vmul.f32 %v419_v60, %v2682_v51  ;;  %v454_v12 = vmul.f32 %v429_v33, %v3528_v36  ;;  %v325_v15 = vmul.f32 %v2864_v48, %v324_v34  ;;  %vm3160_vm9 = vmor %vm326_vm3, %vm327_vm5  ;;  %v3537_v40 = vld [vmem:[#allocation28_spill] sm:$0xff]  ;;  %v3539_v60 = vld [vmem:[#allocation26_spill] sm:$0xff] }
 0x150   :  { %2263 = vrsqrt.f32 %v2939_v56  ;;  %v3533_v35 = vsel %vm2908_vm11, %v3531_v44, %v3532_v20  ;;  %v455_v27 = vmul.f32 %v439_v25, %v3534_v42  ;;  %v1467_v9 = vmul.f32 2.0, %v495_v28  ;;  %v3538_v33 = vld [vmem:[#allocation24_spill] sm:$0xff]  ;;  %v3540_v25 = vld [vmem:[#allocation19_spill] sm:$0xff] }
 0x151   :  { %v1377_v32 = vpop.f32.mrf.mxu2  ;;  %v443_v50 = vmul.f32 %v3533_v35, %v3529_v54  ;;  %v472_v46 = vmul.f32 %v2972_v62, %v453_v16  ;;  %v473_v51 = vmul.f32 %v2972_v62, %v454_v12  ;;  %v334_v17 = vsub.f32 1.5, %v3537_v40 }
 0x152   :  { %v1378_v39 = vadd.f32 %v1377_v32, %v1329_v61  ;;  %v1426_v22 = vpop.f32.mrf.mxu3  ;;  %v471_v61 = vmul.f32 %v2972_v62, %v452_v53  ;;  %v474_v59 = vmul.f32 %v2972_v62, %v455_v27  ;;  %v329_v57 = vsel %vm3160_vm9, %v2864_v48, %v325_v15 }
 0x153   :  { %v3170_v13 = vadd.f32 %v3006_v23, %v472_v46  ;;  %v3173_v7 = vadd.f32 %v3006_v23, %v473_v51  ;;  %v342_v41 = vmul.f32 %v2918_v37, %v341_v47  ;;  %v462_v55 = vmul.f32 %v2972_v62, %v443_v50  ;;  %v3543_v51 = vld [vmem:[#allocation17_spill] sm:$0xff] }
 0x154   :  { %v1427_v26 = vadd.f32 %v1426_v22, %v1378_v39  ;;  %v1284_v11 = vpop.f32.mrf.mxu0  ;;  %v480_v39 = vadd.f32 %v3006_v23, %v461_v52  ;;  %v3167_v19 = vadd.f32 %v3006_v23, %v471_v61  ;;  %v3188_v45 = vadd.f32 %v3006_v23, %v474_v59 }
 0x155   :  { %v1333_v49 = vpop.f32.mrf.mxu1  ;;  %v1285_v32 = vadd.f32 %v3000_v58, %v1284_v11  ;;  %vm336_vm11 = vweird.f32 %v3538_v33  ;;  %vm337_vm10 = vweird.f32 %v3539_v60  ;;  %v335_v38 = vmul.f32 %v3539_v60, %v334_v17 }
 0x156   :  { %v3121_v0 = vadd.f32 %v1466_v30, %v1427_v26  ;;  %v3183_v26 = vpop.eup %2263  ;;  %v496_v30 = vmul.f32 4.0, %v480_v39  ;;  %v343_v1 = vmul.f32 0.5, %v342_v41  ;;  %vm3198_vm12 = vmor %vm336_vm11, %vm337_vm10  ;;  %vm346_vm13 = vweird.f32 %v2832_v24 }
 0x157   :  { %v1334_v11 = vadd.f32 %v1333_v49, %v1285_v32  ;;  %v351_v49 = vmul.f32 %v3183_v26, %v2939_v56  ;;  %vm347_vm14 = vweird.f32 %v2918_v37  ;;  %vm356_vm0 = vweird.f32 %v2939_v56 }
 0x158   :  { %1498 = vadd.xlane.f32.xlu2 %v3121_v0  ;;  %v1468_v47 = vmul.f32 2.0, %v496_v30  ;;  %v344_v15 = vsub.f32 1.5, %v343_v1  ;;  %vm348_vm15 = vmor %vm346_vm13, %vm347_vm14  ;;  %vm357_vm1 = vweird.f32 %v3183_v26 }
 0x159   :  { %v1379_v3 = vpop.f32.mrf.mxu2  ;;  %vm358_vm2 = vmor %vm356_vm0, %vm357_vm1 }
 0x15a   :  { %v1380_v2 = vadd.f32 %v1379_v3, %v1331_v29  ;;  %v1428_v5 = vpop.f32.mrf.mxu3  ;;  %v444_v29 = vmul.f32 %v329_v57, %v3540_v25  ;;  %v481_v3 = vadd.f32 %v3006_v23, %v462_v55  ;;  %v345_v61 = vmul.f32 %v2918_v37, %v344_v15  ;;  %v3544_v55 = vld [vmem:[#allocation20_spill] sm:$0xff] }
 0x15c   :  { %v1429_v43 = vadd.f32 %v1428_v5, %v1380_v2  ;;  %v1286_v34 = vpop.f32.mrf.mxu0  ;;  %v352_v2 = vmul.f32 %v3183_v26, %v351_v49  ;;  %v339_v5 = vsel %vm3198_vm12, %v3539_v60, %v335_v38  ;;  %v497_v14 = vmul.f32 4.0, %v481_v3 }
 0x15d   :  { %v1335_v22 = vpop.f32.mrf.mxu1  ;;  %v1287_v28 = vadd.f32 %v3000_v58, %v1286_v34  ;;  %v463_v44 = vmul.f32 %v2972_v62, %v444_v29  ;;  %v445_v42 = vmul.f32 %v339_v5, %v3543_v51 }
 0x15e   :  { %v3175_v10 = vadd.f32 %v1467_v9, %v1429_v43  ;;  %v353_v46 = vmul.f32 0.5, %v352_v2  ;;  %v1469_v43 = vmul.f32 2.0, %v497_v14 }
 0x15f   :  { %v1336_v54 = vadd.f32 %v1335_v22, %v1287_v28  ;;  %v482_v34 = vadd.f32 %v3006_v23, %v463_v44  ;;  %v349_v22 = vsel %vm348_vm15, %v2918_v37, %v345_v61  ;;  %v464_v17 = vmul.f32 %v2972_v62, %v445_v42 }
 0x160   :  { %1500 = vadd.xlane.f32.xlu0 %v3175_v10  ;;  %v354_v24 = vsub.f32 1.5, %v353_v46 }
 0x161   :  { %v1382_v63 = vpop.f32.mrf.mxu2  ;;  %v498_v40 = vmul.f32 4.0, %v482_v34 }
 0x162   :  { %v1383_v31 = vadd.f32 %v1382_v63, %v1334_v11  ;;  %v1431_v48 = vpop.f32.mrf.mxu3  ;;  %v355_v30 = vmul.f32 %v3183_v26, %v354_v24  ;;  %v446_v63 = vmul.f32 %v349_v22, %v3544_v55 }
 0x164   :  { %v1432_v52 = vadd.f32 %v1431_v48, %v1383_v31  ;;  %v1289_v53 = vpop.f32.mrf.mxu0  ;;  %v1470_v31 = vmul.f32 2.0, %v498_v40  ;;  %v483_v48 = vadd.f32 %v3006_v23, %v464_v17  ;;  %v359_v56 = vsel %vm358_vm2, %v3183_v26, %v355_v30 }
 0x165   :  { %v1338_v36 = vpop.f32.mrf.mxu1  ;;  %v1290_v27 = vadd.f32 %v3000_v58, %v1289_v53  ;;  %v465_v29 = vmul.f32 %v2972_v62, %v446_v63 }
 0x166   :  { %v3202_v12 = vadd.f32 %v1468_v47, %v1432_v52  ;;  %v499_v25 = vmul.f32 4.0, %v483_v48  ;;  %v3545_v47 = vld [vmem:[#allocation21_spill] sm:$0xff] }
 0x167   :  { %v1339_v59 = vadd.f32 %v1338_v36, %v1290_v27  ;;  %v447_v3 = vmul.f32 %v359_v56, %v3545_v47  ;;  %v484_v5 = vadd.f32 %v3006_v23, %v465_v29 }
 0x168   :  { %1502 = vadd.xlane.f32.xlu1 %v3202_v12  ;;  %v1471_v2 = vmul.f32 2.0, %v499_v25 }
 0x169   :  { %v1384_v20 = vpop.f32.mrf.mxu2  ;;  %v500_v44 = vmul.f32 4.0, %v484_v5 }
 0x16a   :  { %v1385_v35 = vadd.f32 %v1384_v20, %v1336_v54  ;;  %v1433_v50 = vpop.f32.mrf.mxu3  ;;  %v466_v20 = vmul.f32 %v2972_v62, %v447_v3 }
 0x16b   :  { %v1472_v27 = vmul.f32 2.0, %v500_v44 }
 0x16c   :  { %v1434_v8 = vadd.f32 %v1433_v50, %v1385_v35  ;;  %v1291_v32 = vpop.f32.mrf.mxu0 }
 0x16d   :  { %v1340_v9 = vpop.f32.mrf.mxu1  ;;  %v1292_v33 = vadd.f32 %v3000_v58, %v1291_v32 }
 0x16e   :  { %v3216_v39 = vadd.f32 %v1469_v43, %v1434_v8  ;;  %v485_v8 = vadd.f32 %v3006_v23, %v466_v20  ;;  %v502_v23 = vmul.f32 4.0, %v3119_v18 }
 0x16f   :  { %v1341_v49 = vadd.f32 %v1340_v9, %v1292_v33 }
 0x170   :  { %1504 = vadd.xlane.f32.xlu2 %v3216_v39  ;;  %v501_v9 = vmul.f32 4.0, %v485_v8 }
 0x171   :  { %v1387_v57 = vpop.f32.mrf.mxu2 }
 0x172   :  { %v1388_v41 = vadd.f32 %v1387_v57, %v1339_v59  ;;  %v1436_v11 = vpop.f32.mrf.mxu3  ;;  %v1473_v17 = vmul.f32 2.0, %v501_v9 }
 0x174   :  { %v1437_v37 = vadd.f32 %v1436_v11, %v1388_v41  ;;  %v1294_v60 = vpop.f32.mrf.mxu0 }
 0x175   :  { %v1343_v38 = vpop.f32.mrf.mxu1  ;;  %v1295_v16 = vadd.f32 %v3000_v58, %v1294_v60 }
 0x176   :  { %v3227_v1 = vadd.f32 %v1470_v31, %v1437_v37  ;;  %v1474_v31 = vmul.f32 2.0, %v502_v23 }
 0x177   :  { %v1344_v14 = vadd.f32 %v1343_v38, %v1295_v16 }
 0x178   :  { %1506 = vadd.xlane.f32.xlu0 %v3227_v1 }
 0x179   :  { %v1389_v28 = vpop.f32.mrf.mxu2 }
 0x17a   :  { %v1390_v52 = vadd.f32 %v1389_v28, %v1341_v49  ;;  %v1438_v53 = vpop.f32.mrf.mxu3  ;;  %v503_v49 = vmul.f32 4.0, %v3132_v6 }
 0x17c   :  { %v1439_v36 = vadd.f32 %v1438_v53, %v1390_v52  ;;  %v1296_v15 = vpop.f32.mrf.mxu0  ;;  %v1475_v47 = vmul.f32 2.0, %v503_v49 }
 0x17d   :  { %v1345_v54 = vpop.f32.mrf.mxu1  ;;  %v1297_v46 = vadd.f32 %v3000_v58, %v1296_v15 }
 0x17e   :  { %v3235_v26 = vadd.f32 %v1471_v2, %v1439_v36  ;;  %v504_v36 = vmul.f32 4.0, %v3135_v4 }
 0x17f   :  { %v1346_v43 = vadd.f32 %v1345_v54, %v1297_v46 }
 0x180   :  { %1508 = vadd.xlane.f32.xlu1 %v3235_v26  ;;  %v1476_v44 = vmul.f32 2.0, %v504_v36  ;;  %v3546_v36 = vld [vmem:[#allocation16_spill] sm:$0xff] }
 0x181   :  { %v1392_v35 = vpop.f32.mrf.mxu2 }
 0x182   :  { %v1393_v50 = vadd.f32 %v1392_v35, %v1344_v14  ;;  %v1441_v61 = vpop.f32.mrf.mxu3 }
 0x184   :  { %v1442_v51 = vadd.f32 %v1441_v61, %v1393_v50  ;;  %v1299_v42 = vpop.f32.mrf.mxu0  ;;  %v505_v61 = vmul.f32 4.0, %v3138_v21 }
 0x185   :  { %v1348_v34 = vpop.f32.mrf.mxu1  ;;  %v1300_v59 = vadd.f32 %v3000_v58, %v1299_v42 }
 0x186   :  { %v3241_v32 = vadd.f32 %v1472_v27, %v1442_v51  ;;  %v1477_v27 = vmul.f32 2.0, %v505_v61 }
 0x187   :  { %v1349_v11 = vadd.f32 %v1348_v34, %v1300_v59 }
 0x188   :  { %1510 = vadd.xlane.f32.xlu2 %v3241_v32 }
 0x189   :  { %v1394_v24 = vpop.f32.mrf.mxu2 }
 0x18a   :  { %v1395_v22 = vadd.f32 %v1394_v24, %v1346_v43  ;;  %v1443_v62 = vpop.f32.mrf.mxu3 }
 0x18c   :  { %v1444_v40 = vadd.f32 %v1443_v62, %v1395_v22  ;;  %v1301_v57 = vpop.f32.mrf.mxu0  ;;  %v506_v22 = vmul.f32 4.0, %v3167_v19 }
 0x18d   :  { %v1350_v55 = vpop.f32.mrf.mxu1  ;;  %v1302_v37 = vadd.f32 %v3000_v58, %v1301_v57 }
 0x18e   :  { %v3245_v41 = vadd.f32 %v1473_v17, %v1444_v40  ;;  %v1478_v23 = vmul.f32 2.0, %v506_v22 }
 0x18f   :  { %v1351_v38 = vadd.f32 %v1350_v55, %v1302_v37 }
 0x190   :  { %1512 = vadd.xlane.f32.xlu0 %v3245_v41 }
 0x191   :  { %v1397_v30 = vpop.f32.mrf.mxu2 }
 0x192   :  { %v1398_v63 = vadd.f32 %v1397_v30, %v1349_v11  ;;  %v1446_v33 = vpop.f32.mrf.mxu3 }
 0x194   :  { %v1447_v60 = vadd.f32 %v1446_v33, %v1398_v63  ;;  %v507_v63 = vmul.f32 4.0, %v3170_v13 }
 0x196   :  { %v3250_v48 = vadd.f32 %v1474_v31, %v1447_v60  ;;  %v1304_v56 = vpop.f32.mrf.mxu0  ;;  %v1353_v52 = vpop.f32.mrf.mxu1 }
 0x197   :  { %v1305_v18 = vadd.f32 %v3000_v58, %v1304_v56 }
 0x198   :  { %1514 = vadd.xlane.f32.xlu1 %v3250_v48 }
 0x199   :  { %v1399_v25 = vpop.f32.mrf.mxu2  ;;  %v1354_v16 = vadd.f32 %v1353_v52, %v1305_v18 }
 0x19a   :  { %v1400_v29 = vadd.f32 %v1399_v25, %v1351_v38  ;;  %v1448_v28 = vpop.f32.mrf.mxu3  ;;  %v1479_v38 = vmul.f32 2.0, %v507_v63 }
 0x19c   :  { %v1449_v53 = vadd.f32 %v1448_v28, %v1400_v29 }
 0x19e   :  { %v3255_v3 = vadd.f32 %v1475_v47, %v1449_v53  ;;  %v1306_v15 = vpop.f32.mrf.mxu0  ;;  %v1355_v20 = vpop.f32.mrf.mxu1  ;;  %v508_v53 = vmul.f32 4.0, %v3173_v7  ;;  %v509_v7 = vmul.f32 4.0, %v3188_v45 }
 0x19f   :  { %v1307_v6 = vadd.f32 %v3000_v58, %v1306_v15 }
 0x1a0   :  { %1516 = vadd.xlane.f32.xlu2 %v3255_v3 }
 0x1a1   :  { %v1402_v2 = vpop.f32.mrf.mxu2  ;;  %v1356_v50 = vadd.f32 %v1355_v20, %v1307_v6 }
 0x1a2   :  { %v1403_v5 = vadd.f32 %v1402_v2, %v1354_v16  ;;  %v1451_v54 = vpop.f32.mrf.mxu3 }
 0x1a4   :  { %v1452_v14 = vadd.f32 %v1451_v54, %v1403_v5  ;;  %v1480_v5 = vmul.f32 2.0, %v508_v53 }
 0x1a6   :  { %v3260_v35 = vadd.f32 %v1476_v44, %v1452_v14  ;;  %v1309_v43 = vpop.f32.mrf.mxu0  ;;  %v1358_v34 = vpop.f32.mrf.mxu1 }
 0x1a7   :  { %v1310_v9 = vadd.f32 %v3000_v58, %v1309_v43 }
 0x1a8   :  { %1518 = vadd.xlane.f32.xlu0 %v3260_v35 }
 0x1a9   :  { %v1404_v46 = vpop.f32.mrf.mxu2  ;;  %v1359_v24 = vadd.f32 %v1358_v34, %v1310_v9 }
 0x1aa   :  { %v1405_v51 = vadd.f32 %v1404_v46, %v1356_v50  ;;  %v1453_v42 = vpop.f32.mrf.mxu3 }
 0x1ac   :  { %v1454_v4 = vadd.f32 %v1453_v42, %v1405_v51 }
 0x1ae   :  { %v3264_v8 = vadd.f32 %v1477_v27, %v1454_v4  ;;  %v1311_v62 = vpop.f32.mrf.mxu0  ;;  %v1360_v57 = vpop.f32.mrf.mxu1 }
 0x1af   :  { %v1312_v17 = vadd.f32 %v3000_v58, %v1311_v62 }
 0x1b0   :  { %1520 = vadd.xlane.f32.xlu1 %v3264_v8 }
 0x1b1   :  { %v1407_v59 = vpop.f32.mrf.mxu2  ;;  %v1361_v55 = vadd.f32 %v1360_v57, %v1312_v17 }
 0x1b2   :  { %v1408_v40 = vadd.f32 %v1407_v59, %v1359_v24  ;;  %v1456_v21 = vpop.f32.mrf.mxu3 }
 0x1b4   :  { %v1457_v11 = vadd.f32 %v1456_v21, %v1408_v40 }
 0x1b6   :  { %v3270_v30 = vadd.f32 %v1478_v23, %v1457_v11  ;;  %v1314_v37 = vpop.f32.mrf.mxu0 }
 0x1b7   :  { %v1315_v56 = vadd.f32 %v3000_v58, %v1314_v37 }
 0x1b8   :  { %1522 = vadd.xlane.f32.xlu2 %v3270_v30 }
 0x1b9   :  { %v1409_v33 = vpop.f32.mrf.mxu2  ;;  %v1363_v49 = vpop.f32.mrf.mxu1 }
 0x1ba   :  { %v1410_v60 = vadd.f32 %v1409_v33, %v1361_v55  ;;  %v1458_v19 = vpop.f32.mrf.mxu3  ;;  %v1364_v29 = vadd.f32 %v1363_v49, %v1315_v56 }
 0x1bc   :  { %v1459_v31 = vadd.f32 %v1458_v19, %v1410_v60 }
 0x1be   :  { %v3275_v25 = vadd.f32 %v1479_v38, %v1459_v31  ;;  %v1316_v28 = vpop.f32.mrf.mxu0 }
 0x1bf   :  { %v1317_v13 = vadd.f32 %v3000_v58, %v1316_v28 }
 0x1c0   :  { %1524 = vadd.xlane.f32.xlu0 %v3275_v25 }
 0x1c1   :  { %v1412_v18 = vpop.f32.mrf.mxu2  ;;  %v1365_v54 = vpop.f32.mrf.mxu1 }
 0x1c2   :  { %v1413_v52 = vadd.f32 %v1412_v18, %v1364_v29  ;;  %v1461_v16 = vpop.f32.mrf.mxu3  ;;  %v1366_v14 = vadd.f32 %v1365_v54, %v1317_v13 }
 0x1c4   :  { %v1462_v2 = vadd.f32 %v1461_v16, %v1413_v52 }
 0x1c6   :  { %v3284_v44 = vadd.f32 %v1480_v5, %v1462_v2 }
 0x1c8   :  { %1526 = vadd.xlane.f32.xlu1 %v3284_v44 }
 0x1c9   :  { %v1414_v20 = vpop.f32.mrf.mxu2 }
 0x1ca   :  { %v1415_v58 = vadd.f32 %v1414_v20, %v1366_v14  ;;  %v1463_v46 = vpop.f32.mrf.mxu3 }
 0x1cb   :  { %v1499_v47 = vpop.xlane.xlu2 %1498 }
 0x1cc   :  { %v1530_v15 = vmul.f32 %v1499_v47, %v3546_v36  ;;  %v1464_v42 = vadd.f32 %v1463_v46, %v1415_v58 }
 0x1ce   :  { %v3282_v6 = vsub.f32 %v3121_v0, %v1530_v15  ;;  %v1481_v0 = vmul.f32 2.0, %v509_v7 }
 0x1d0   :  { %v1562_v50 = vmul.f32 %v3282_v6, %v3282_v6  ;;  %v3294_v27 = vadd.f32 %v1481_v0, %v1464_v42 }
 0x1d2   :  { %1578 = vadd.xlane.f32.xlu0 %v1562_v50  ;;  %1528 = vadd.xlane.f32.xlu2 %v3294_v27 }
 0x1d3   :  { %v1501_v61 = vpop.xlane.xlu0 %1500 }
 0x1d4   :  { %v1531_v51 = vmul.f32 %v1501_v61, %v3546_v36 }
 0x1d6   :  { %v3292_v4 = vsub.f32 %v3175_v10, %v1531_v51 }
 0x1d8   :  { %v1563_v43 = vmul.f32 %v3292_v4, %v3292_v4 }
 0x1da   :  { %1580 = vadd.xlane.f32.xlu1 %v1563_v43 }
 0x1db   :  { %v1503_v34 = vpop.xlane.xlu1 %1502 }
 0x1dc   :  { %v1532_v45 = vmul.f32 %v1503_v34, %v3546_v36 }
 0x1de   :  { %v3301_v9 = vsub.f32 %v3202_v12, %v1532_v45 }
 0x1e0   :  { %v1564_v24 = vmul.f32 %v3301_v9, %v3301_v9 }
 0x1e2   :  { %1582 = vadd.xlane.f32.xlu2 %v1564_v24 }
 0x1e3   :  { %v1505_v10 = vpop.xlane.xlu2 %1504 }
 0x1e4   :  { %v1533_v22 = vmul.f32 %v1505_v10, %v3546_v36 }
 0x1e6   :  { %v3307_v62 = vsub.f32 %v3216_v39, %v1533_v22 }
 0x1e8   :  { %v1565_v59 = vmul.f32 %v3307_v62, %v3307_v62 }
 0x1ea   :  { %1584 = vadd.xlane.f32.xlu0 %v1565_v59 }
 0x1eb   :  { %v1507_v40 = vpop.xlane.xlu0 %1506 }
 0x1ec   :  { %v1534_v21 = vmul.f32 %v1507_v40, %v3546_v36 }
 0x1ee   :  { %v3313_v12 = vsub.f32 %v3227_v1, %v1534_v21 }
 0x1f0   :  { %v1566_v17 = vmul.f32 %v3313_v12, %v3313_v12 }
 0x1f2   :  { %1586 = vadd.xlane.f32.xlu1 %v1566_v17 }
 0x1f3   :  { %v1509_v57 = vpop.xlane.xlu1 %1508 }
 0x1f4   :  { %v1535_v11 = vmul.f32 %v1509_v57, %v3546_v36 }
 0x1f6   :  { %v3319_v39 = vsub.f32 %v3235_v26, %v1535_v11 }
 0x1f8   :  { %v1567_v23 = vmul.f32 %v3319_v39, %v3319_v39 }
 0x1fa   :  { %1588 = vadd.xlane.f32.xlu2 %v1567_v23 }
 0x1fb   :  { %v1511_v55 = vpop.xlane.xlu2 %1510 }
 0x1fc   :  { %v1536_v63 = vmul.f32 %v1511_v55, %v3546_v36  ;;  %v3389_v55 = vld [vmem:[%s3470_s7] ss:$0 sm:$0xff]  ;;  %s2461_s7 = smov [#allocation11]  }
 0x1fe   :  { %v3325_v1 = vsub.f32 %v3241_v32, %v1536_v63 }
 0x200   :  { %v1568_v33 = vmul.f32 %v3325_v1, %v3325_v1 }
 0x202   :  { %1590 = vadd.xlane.f32.xlu0 %v1568_v33 }
 0x203   :  { %v1513_v37 = vpop.xlane.xlu0 %1512 }
 0x204   :  { %v1537_v60 = vmul.f32 %v1513_v37, %v3546_v36  ;;  %v3394_v37 = vld [vmem:[%s3471_s8] ss:$0 sm:$0xff]  ;;  %s1876_s8 = sshll.u32 %s2461_s7, 4  ;;  %s1877_s8 = int_to_ptr.vmem [resolvable:$true] %s1876_s8 }
 0x206   :  { %v3331_v26 = vsub.f32 %v3245_v41, %v1537_v60 }
 0x208   :  { %v1569_v19 = vmul.f32 %v3331_v26, %v3331_v26 }
 0x20a   :  { %1592 = vadd.xlane.f32.xlu1 %v1569_v19 }
 0x20b   :  { %v1515_v31 = vpop.xlane.xlu1 %1514 }
 0x20c   :  { %v1538_v38 = vmul.f32 %v1515_v31, %v3546_v36 }
 0x20e   :  { %v3337_v32 = vsub.f32 %v3250_v48, %v1538_v38 }
 0x210   :  { %v1570_v56 = vmul.f32 %v3337_v32, %v3337_v32 }
 0x212   :  { %1594 = vadd.xlane.f32.xlu2 %v1570_v56 }
 0x213   :  { %v1517_v49 = vpop.xlane.xlu2 %1516 }
 0x214   :  { %v1539_v29 = vmul.f32 %v1517_v49, %v3546_v36 }
 0x216   :  { %v3343_v41 = vsub.f32 %v3255_v3, %v1539_v29 }
 0x218   :  { %v1571_v28 = vmul.f32 %v3343_v41, %v3343_v41 }
 0x21a   :  { %1596 = vadd.xlane.f32.xlu0 %v1571_v28 }
 0x21b   :  { %v1519_v18 = vpop.xlane.xlu0 %1518 }
 0x21c   :  { %v1540_v52 = vmul.f32 %v1519_v18, %v3546_v36 }
 0x21e   :  { %v3349_v48 = vsub.f32 %v3260_v35, %v1540_v52 }
 0x220   :  { %v1572_v53 = vmul.f32 %v3349_v48, %v3349_v48 }
 0x222   :  { %1598 = vadd.xlane.f32.xlu1 %v1572_v53 }
 0x223   :  { %v1521_v13 = vpop.xlane.xlu1 %1520 }
 0x224   :  { %v1541_v47 = vmul.f32 %v1521_v13, %v3546_v36 }
 0x226   :  { %v3355_v3 = vsub.f32 %v3264_v8, %v1541_v47 }
 0x228   :  { %v1573_v16 = vmul.f32 %v3355_v3, %v3355_v3 }
 0x22a   :  { %1600 = vadd.xlane.f32.xlu2 %v1573_v16 }
 0x22b   :  { %v1523_v15 = vpop.xlane.xlu2 %1522 }
 0x22c   :  { %v1542_v2 = vmul.f32 %v1523_v15, %v3546_v36 }
 0x22e   :  { %v3361_v35 = vsub.f32 %v3270_v30, %v1542_v2 }
 0x230   :  { %v1574_v5 = vmul.f32 %v3361_v35, %v3361_v35 }
 0x232   :  { %1602 = vadd.xlane.f32.xlu0 %v1574_v5 }
 0x233   :  { %v1525_v54 = vpop.xlane.xlu0 %1524 }
 0x234   :  { %v1543_v14 = vmul.f32 %v1525_v54, %v3546_v36 }
 0x236   :  { %v3367_v8 = vsub.f32 %v3275_v25, %v1543_v14 }
 0x238   :  { %v1575_v20 = vmul.f32 %v3367_v8, %v3367_v8 }
 0x23a   :  { %1604 = vadd.xlane.f32.xlu1 %v1575_v20 }
 0x23b   :  { %v1527_v50 = vpop.xlane.xlu1 %1526 }
 0x23c   :  { %v1544_v58 = vmul.f32 %v1527_v50, %v3546_v36 }
 0x23e   :  { %v3374_v61 = vsub.f32 %v3284_v44, %v1544_v58 }
 0x240   :  { %v1576_v51 = vmul.f32 %v3374_v61, %v3374_v61 }
 0x242   :  { %1606 = vadd.xlane.f32.xlu2 %v1576_v51 }
 0x245   :  { %v1579_v7 = vpop.xlane.xlu0 %1578  ;;  %v1529_v25 = vpop.xlane.xlu2 %1528 }
 0x246   :  { %v1610_v30 = vmul.f32 %v1579_v7, %v3546_v36  ;;  %v1545_v42 = vmul.f32 %v1529_v25, %v3546_v36 }
 0x248   :  { %v1626_v46 = vadd.f32 1e-05, %v1610_v30  ;;  %v3381_v34 = vsub.f32 %v3294_v27, %v1545_v42 }
 0x24a   :  { %2265 = vrsqrt.f32 %v1626_v46  ;;  %v1577_v44 = vmul.f32 %v3381_v34, %v3381_v34  ;;  %vm1648_vm4 = vweird.f32 %v1626_v46 }
 0x24c   :  { %1608 = vadd.xlane.f32.xlu0 %v1577_v44 }
 0x24d   :  { %v1581_v0 = vpop.xlane.xlu1 %1580 }
 0x24e   :  { %v1611_v43 = vmul.f32 %v1581_v0, %v3546_v36 }
 0x250   :  { %v2266_v45 = vpop.eup %2265  ;;  %v1627_v24 = vadd.f32 1e-05, %v1611_v43 }
 0x251   :  { %v1643_v10 = vmul.f32 %v2266_v45, %v1626_v46  ;;  %vm1649_vm3 = vweird.f32 %v2266_v45 }
 0x252   :  { %2267 = vrsqrt.f32 %v1627_v24  ;;  %vm1650_vm6 = vmor %vm1648_vm4, %vm1649_vm3  ;;  %vm1658_vm8 = vweird.f32 %v1627_v24 }
 0x253   :  { %v1644_v22 = vmul.f32 %v2266_v45, %v1643_v10 }
 0x255   :  { %v1645_v59 = vmul.f32 0.5, %v1644_v22  ;;  %v1583_v40 = vpop.xlane.xlu2 %1582 }
 0x256   :  { %v1612_v21 = vmul.f32 %v1583_v40, %v3546_v36 }
 0x257   :  { %v1646_v17 = vsub.f32 1.5, %v1645_v59 }
 0x258   :  { %v2268_v57 = vpop.eup %2267  ;;  %v1628_v11 = vadd.f32 1e-05, %v1612_v21 }
 0x259   :  { %v1647_v23 = vmul.f32 %v2266_v45, %v1646_v17  ;;  %v1653_v27 = vmul.f32 %v2268_v57, %v1627_v24  ;;  %vm1659_vm7 = vweird.f32 %v2268_v57 }
 0x25a   :  { %2269 = vrsqrt.f32 %v1628_v11  ;;  %vm1660_vm5 = vmor %vm1658_vm8, %vm1659_vm7  ;;  %vm1668_vm11 = vweird.f32 %v1628_v11 }
 0x25b   :  { %v1651_v63 = vsel %vm1650_vm6, %v2266_v45, %v1647_v23  ;;  %v1654_v33 = vmul.f32 %v2268_v57, %v1653_v27 }
 0x25c   :  { %v1802_v60 = vmul.f32 %v1651_v63, %v3282_v6 }
 0x25d   :  { %v1655_v19 = vmul.f32 0.5, %v1654_v33  ;;  %v1585_v31 = vpop.xlane.xlu0 %1584 }
 0x25e   :  { %v1821_v38 = vmul.f32 %v3389_v55, %v1802_v60  ;;  %v1613_v56 = vmul.f32 %v1585_v31, %v3546_v36 }
 0x25f   :  { %v1656_v49 = vsub.f32 1.5, %v1655_v19 }
 0x260   :  { %v2270_v29 = vpop.eup %2269  ;;  %v1840_v28 = vadd.f32 %v3394_v37, %v1821_v38  ;;  %v1629_v18 = vadd.f32 1e-05, %v1613_v56 }
 0x261   :  { %v1657_v52 = vmul.f32 %v2268_v57, %v1656_v49  ;;  %v1663_v53 = vmul.f32 %v2270_v29, %v1628_v11  ;;  %vm1669_vm9 = vweird.f32 %v2270_v29 }
 0x262   :  { %1856 = vst [vmem:[#allocation11] sm:$0xff] %v1840_v28  ;;  %2271 = vrsqrt.f32 %v1629_v18  ;;  %vm1670_vm10 = vmor %vm1668_vm11, %vm1669_vm9  ;;  %vm1678_vm13 = vweird.f32 %v1629_v18 }
 0x263   :  { %v1661_v13 = vsel %vm1660_vm5, %v2268_v57, %v1657_v52  ;;  %v1664_v6 = vmul.f32 %v2270_v29, %v1663_v53 }
 0x264   :  { %v1803_v47 = vmul.f32 %v1661_v13, %v3292_v4 }
 0x265   :  { %v1665_v16 = vmul.f32 0.5, %v1664_v6  ;;  %v1587_v15 = vpop.xlane.xlu1 %1586 }
 0x266   :  { %v1822_v2 = vmul.f32 %v3389_v55, %v1803_v47  ;;  %v1614_v5 = vmul.f32 %v1587_v15, %v3546_v36 }
 0x267   :  { %v1666_v54 = vsub.f32 1.5, %v1665_v16 }
 0x268   :  { %v2272_v14 = vpop.eup %2271  ;;  %v1841_v20 = vadd.f32 %v3394_v37, %v1822_v2  ;;  %v1630_v50 = vadd.f32 1e-05, %v1614_v5 }
 0x269   :  { %v1667_v58 = vmul.f32 %v2270_v29, %v1666_v54  ;;  %v1673_v7 = vmul.f32 %v2272_v14, %v1629_v18  ;;  %vm1679_vm12 = vweird.f32 %v2272_v14 }
 0x26a   :  { %1857 = vst [vmem:[#allocation11 + $0x8] sm:$0xff] %v1841_v20  ;;  %2273 = vrsqrt.f32 %v1630_v50  ;;  %vm1680_vm14 = vmor %vm1678_vm13, %vm1679_vm12  ;;  %vm1688_vm0 = vweird.f32 %v1630_v50 }
 0x26b   :  { %v1671_v30 = vsel %vm1670_vm10, %v2270_v29, %v1667_v58  ;;  %v1674_v4 = vmul.f32 %v2272_v14, %v1673_v7 }
 0x26c   :  { %v1804_v46 = vmul.f32 %v1671_v30, %v3301_v9 }
 0x26d   :  { %v1675_v51 = vmul.f32 0.5, %v1674_v4  ;;  %v1589_v25 = vpop.xlane.xlu2 %1588 }
 0x26e   :  { %v1823_v42 = vmul.f32 %v3389_v55, %v1804_v46  ;;  %v1615_v0 = vmul.f32 %v1589_v25, %v3546_v36 }
 0x26f   :  { %v1676_v43 = vsub.f32 1.5, %v1675_v51 }
 0x270   :  { %v2274_v45 = vpop.eup %2273  ;;  %v1842_v24 = vadd.f32 %v3394_v37, %v1823_v42  ;;  %v1631_v10 = vadd.f32 1e-05, %v1615_v0 }
 0x271   :  { %v1677_v44 = vmul.f32 %v2272_v14, %v1676_v43  ;;  %v1683_v22 = vmul.f32 %v2274_v45, %v1630_v50  ;;  %vm1689_vm15 = vweird.f32 %v2274_v45 }
 0x272   :  { %1858 = vst [vmem:[#allocation11 + $0x10] sm:$0xff] %v1842_v24  ;;  %2275 = vrsqrt.f32 %v1631_v10  ;;  %vm1690_vm1 = vmor %vm1688_vm0, %vm1689_vm15  ;;  %vm1698_vm3 = vweird.f32 %v1631_v10 }
 0x273   :  { %v1681_v59 = vsel %vm1680_vm14, %v2272_v14, %v1677_v44  ;;  %v1684_v9 = vmul.f32 %v2274_v45, %v1683_v22 }
 0x274   :  { %v1805_v40 = vmul.f32 %v1681_v59, %v3307_v62 }
 0x275   :  { %v1685_v21 = vmul.f32 0.5, %v1684_v9  ;;  %v1591_v17 = vpop.xlane.xlu0 %1590 }
 0x276   :  { %v1824_v57 = vmul.f32 %v3389_v55, %v1805_v40  ;;  %v1616_v11 = vmul.f32 %v1591_v17, %v3546_v36 }
 0x277   :  { %v1686_v23 = vsub.f32 1.5, %v1685_v21 }
 0x278   :  { %v2276_v27 = vpop.eup %2275  ;;  %v1843_v63 = vadd.f32 %v3394_v37, %v1824_v57  ;;  %v1632_v33 = vadd.f32 1e-05, %v1616_v11 }
 0x279   :  { %v1687_v60 = vmul.f32 %v2274_v45, %v1686_v23  ;;  %v1693_v19 = vmul.f32 %v2276_v27, %v1631_v10  ;;  %vm1699_vm2 = vweird.f32 %v2276_v27 }
 0x27a   :  { %1859 = vst [vmem:[#allocation11 + $0x18] sm:$0xff] %v1843_v63  ;;  %2277 = vrsqrt.f32 %v1632_v33  ;;  %vm1700_vm4 = vmor %vm1698_vm3, %vm1699_vm2  ;;  %vm1708_vm7 = vweird.f32 %v1632_v33 }
 0x27b   :  { %v1691_v31 = vsel %vm1690_vm1, %v2274_v45, %v1687_v60  ;;  %v1694_v62 = vmul.f32 %v2276_v27, %v1693_v19 }
 0x27c   :  { %v1806_v38 = vmul.f32 %v1691_v31, %v3313_v12 }
 0x27d   :  { %v1695_v56 = vmul.f32 0.5, %v1694_v62  ;;  %v1593_v49 = vpop.xlane.xlu1 %1592 }
 0x27e   :  { %v1825_v29 = vmul.f32 %v3389_v55, %v1806_v38  ;;  %v1617_v28 = vmul.f32 %v1593_v49, %v3546_v36 }
 0x27f   :  { %v1696_v18 = vsub.f32 1.5, %v1695_v56 }
 0x280   :  { %v2278_v52 = vpop.eup %2277  ;;  %v1844_v53 = vadd.f32 %v3394_v37, %v1825_v29  ;;  %v1633_v13 = vadd.f32 1e-05, %v1617_v28 }
 0x281   :  { %v1697_v6 = vmul.f32 %v2276_v27, %v1696_v18  ;;  %v1703_v47 = vmul.f32 %v2278_v52, %v1632_v33  ;;  %vm1709_vm6 = vweird.f32 %v2278_v52 }
 0x282   :  { %1860 = vst [vmem:[#allocation11 + $0x20] sm:$0xff] %v1844_v53  ;;  %2279 = vrsqrt.f32 %v1633_v13  ;;  %vm1710_vm8 = vmor %vm1708_vm7, %vm1709_vm6  ;;  %vm1718_vm9 = vweird.f32 %v1633_v13 }
 0x283   :  { %v1701_v16 = vsel %vm1700_vm4, %v2276_v27, %v1697_v6  ;;  %v1704_v12 = vmul.f32 %v2278_v52, %v1703_v47 }
 0x284   :  { %v1807_v15 = vmul.f32 %v1701_v16, %v3319_v39 }
 0x285   :  { %v1705_v2 = vmul.f32 0.5, %v1704_v12  ;;  %v1595_v5 = vpop.xlane.xlu2 %1594 }
 0x286   :  { %v1826_v54 = vmul.f32 %v3389_v55, %v1807_v15  ;;  %v1618_v14 = vmul.f32 %v1595_v5, %v3546_v36 }
 0x287   :  { %v1706_v20 = vsub.f32 1.5, %v1705_v2 }
 0x288   :  { %v2280_v50 = vpop.eup %2279  ;;  %v1845_v58 = vadd.f32 %v3394_v37, %v1826_v54  ;;  %v1634_v7 = vadd.f32 1e-05, %v1618_v14 }
 0x289   :  { %v1707_v30 = vmul.f32 %v2278_v52, %v1706_v20  ;;  %v1713_v4 = vmul.f32 %v2280_v50, %v1633_v13  ;;  %vm1719_vm5 = vweird.f32 %v2280_v50 }
 0x28a   :  { %1861 = vst [vmem:[#allocation11 + $0x28] sm:$0xff] %v1845_v58  ;;  %2281 = vrsqrt.f32 %v1634_v7  ;;  %vm1720_vm11 = vmor %vm1718_vm9, %vm1719_vm5  ;;  %vm1728_vm12 = vweird.f32 %v1634_v7 }
 0x28b   :  { %v1711_v46 = vsel %vm1710_vm8, %v2278_v52, %v1707_v30  ;;  %v1714_v39 = vmul.f32 %v2280_v50, %v1713_v4 }
 0x28c   :  { %v1808_v51 = vmul.f32 %v1711_v46, %v3325_v1 }
 0x28d   :  { %v1715_v25 = vmul.f32 0.5, %v1714_v39  ;;  %v1597_v42 = vpop.xlane.xlu0 %1596 }
 0x28e   :  { %v1827_v0 = vmul.f32 %v3389_v55, %v1808_v51  ;;  %v1619_v43 = vmul.f32 %v1597_v42, %v3546_v36 }
 0x28f   :  { %v1716_v45 = vsub.f32 1.5, %v1715_v25 }
 0x290   :  { %v2282_v24 = vpop.eup %2281  ;;  %v1846_v10 = vadd.f32 %v3394_v37, %v1827_v0  ;;  %v1635_v44 = vadd.f32 1e-05, %v1619_v43 }
 0x291   :  { %v1717_v22 = vmul.f32 %v2280_v50, %v1716_v45  ;;  %v1723_v59 = vmul.f32 %v2282_v24, %v1634_v7  ;;  %vm1729_vm10 = vweird.f32 %v2282_v24 }
 0x292   :  { %1862 = vst [vmem:[#allocation11 + $0x30] sm:$0xff] %v1846_v10  ;;  %2283 = vrsqrt.f32 %v1635_v44  ;;  %vm1730_vm13 = vmor %vm1728_vm12, %vm1729_vm10  ;;  %vm1738_vm15 = vweird.f32 %v1635_v44 }
 0x293   :  { %v1721_v9 = vsel %vm1720_vm11, %v2280_v50, %v1717_v22  ;;  %v1724_v1 = vmul.f32 %v2282_v24, %v1723_v59 }
 0x294   :  { %v1809_v40 = vmul.f32 %v1721_v9, %v3331_v26 }
 0x295   :  { %v1725_v21 = vmul.f32 0.5, %v1724_v1  ;;  %v1599_v17 = vpop.xlane.xlu1 %1598 }
 0x296   :  { %v1828_v57 = vmul.f32 %v3389_v55, %v1809_v40  ;;  %v1620_v11 = vmul.f32 %v1599_v17, %v3546_v36 }
 0x297   :  { %v1726_v23 = vsub.f32 1.5, %v1725_v21 }
 0x298   :  { %v2284_v27 = vpop.eup %2283  ;;  %v1847_v63 = vadd.f32 %v3394_v37, %v1828_v57  ;;  %v1636_v33 = vadd.f32 1e-05, %v1620_v11 }
 0x299   :  { %v1727_v60 = vmul.f32 %v2282_v24, %v1726_v23  ;;  %v1733_v19 = vmul.f32 %v2284_v27, %v1635_v44  ;;  %vm1739_vm14 = vweird.f32 %v2284_v27 }
 0x29a   :  { %1863 = vst [vmem:[#allocation11 + $0x38] sm:$0xff] %v1847_v63  ;;  %2285 = vrsqrt.f32 %v1636_v33  ;;  %vm1740_vm0 = vmor %vm1738_vm15, %vm1739_vm14  ;;  %vm1748_vm2 = vweird.f32 %v1636_v33 }
 0x29b   :  { %v1731_v31 = vsel %vm1730_vm13, %v2282_v24, %v1727_v60  ;;  %v1734_v26 = vmul.f32 %v2284_v27, %v1733_v19 }
 0x29c   :  { %v1810_v62 = vmul.f32 %v1731_v31, %v3337_v32 }
 0x29d   :  { %v1735_v38 = vmul.f32 0.5, %v1734_v26  ;;  %v1601_v56 = vpop.xlane.xlu2 %1600 }
 0x29e   :  { %v1829_v49 = vmul.f32 %v3389_v55, %v1810_v62  ;;  %v1621_v29 = vmul.f32 %v1601_v56, %v3546_v36 }
 0x29f   :  { %v1736_v28 = vsub.f32 1.5, %v1735_v38 }
 0x2a0   :  { %v2286_v18 = vpop.eup %2285  ;;  %v1848_v52 = vadd.f32 %v3394_v37, %v1829_v49  ;;  %v1637_v53 = vadd.f32 1e-05, %v1621_v29 }
 0x2a1   :  { %v1737_v13 = vmul.f32 %v2284_v27, %v1736_v28  ;;  %v1743_v6 = vmul.f32 %v2286_v18, %v1636_v33  ;;  %vm1749_vm1 = vweird.f32 %v2286_v18 }
 0x2a2   :  { %1864 = vst [vmem:[#allocation11 + $0x40] sm:$0xff] %v1848_v52  ;;  %2287 = vrsqrt.f32 %v1637_v53  ;;  %vm1750_vm3 = vmor %vm1748_vm2, %vm1749_vm1  ;;  %vm1758_vm6 = vweird.f32 %v1637_v53 }
 0x2a3   :  { %v1741_v47 = vsel %vm1740_vm0, %v2284_v27, %v1737_v13  ;;  %v1744_v32 = vmul.f32 %v2286_v18, %v1743_v6 }
 0x2a4   :  { %v1811_v16 = vmul.f32 %v1741_v47, %v3343_v41 }
 0x2a5   :  { %v1745_v12 = vmul.f32 0.5, %v1744_v32  ;;  %v1603_v7 = vpop.xlane.xlu0 %1602 }
 0x2a6   :  { %v1830_v15 = vmul.f32 %v3389_v55, %v1811_v16  ;;  %v1622_v41 = vmul.f32 %v1603_v7, %v3546_v36 }
 0x2a7   :  { %v1746_v2 = vsub.f32 1.5, %v1745_v12 }
 0x2a8   :  { %v2288_v5 = vpop.eup %2287  ;;  %v1849_v54 = vadd.f32 %v3394_v37, %v1830_v15  ;;  %v1638_v39 = vadd.f32 1e-05, %v1622_v41 }
 0x2a9   :  { %v1747_v14 = vmul.f32 %v2286_v18, %v1746_v2  ;;  %v1753_v20 = vmul.f32 %v2288_v5, %v1637_v53  ;;  %vm1759_vm4 = vweird.f32 %v2288_v5 }
 0x2aa   :  { %1865 = vst [vmem:[#allocation11 + $0x48] sm:$0xff] %v1849_v54  ;;  %2289 = vrsqrt.f32 %v1638_v39  ;;  %vm1760_vm7 = vmor %vm1758_vm6, %vm1759_vm4  ;;  %vm1768_vm5 = vweird.f32 %v1638_v39 }
 0x2ab   :  { %v1751_v50 = vsel %vm1750_vm3, %v2286_v18, %v1747_v14  ;;  %v1754_v58 = vmul.f32 %v2288_v5, %v1753_v20 }
 0x2ac   :  { %v1812_v30 = vmul.f32 %v1751_v50, %v3349_v48 }
 0x2ad   :  { %v1755_v4 = vmul.f32 0.5, %v1754_v58  ;;  %v1605_v43 = vpop.xlane.xlu1 %1604 }
 0x2ae   :  { %v1831_v46 = vmul.f32 %v3389_v55, %v1812_v30  ;;  %v1623_v48 = vmul.f32 %v1605_v43, %v3546_v36 }
 0x2af   :  { %v1756_v51 = vsub.f32 1.5, %v1755_v4 }
 0x2b0   :  { %v1850_v25 = vadd.f32 %v3394_v37, %v1831_v46  ;;  %v2290_v24 = vpop.eup %2289  ;;  %v1639_v44 = vadd.f32 1e-05, %v1623_v48 }
 0x2b1   :  { %v1757_v42 = vmul.f32 %v2288_v5, %v1756_v51  ;;  %v1763_v22 = vmul.f32 %v2290_v24, %v1638_v39  ;;  %vm1769_vm8 = vweird.f32 %v2290_v24 }
 0x2b2   :  { %1866 = vst [vmem:[#allocation11 + $0x50] sm:$0xff] %v1850_v25  ;;  %2291 = vrsqrt.f32 %v1639_v44  ;;  %vm1770_vm9 = vmor %vm1768_vm5, %vm1769_vm8  ;;  %vm1778_vm10 = vweird.f32 %v1639_v44 }
 0x2b3   :  { %v1761_v0 = vsel %vm1760_vm7, %v2288_v5, %v1757_v42  ;;  %v1764_v9 = vmul.f32 %v2290_v24, %v1763_v22 }
 0x2b4   :  { %v1813_v45 = vmul.f32 %v1761_v0, %v3355_v3 }
 0x2b5   :  { %v1765_v1 = vmul.f32 0.5, %v1764_v9  ;;  %v1607_v17 = vpop.xlane.xlu2 %1606 }
 0x2b6   :  { %v1832_v10 = vmul.f32 %v3389_v55, %v1813_v45  ;;  %v1624_v11 = vmul.f32 %v1607_v17, %v3546_v36 }
 0x2b7   :  { %v1766_v40 = vsub.f32 1.5, %v1765_v1 }
 0x2b8   :  { %v1851_v59 = vadd.f32 %v3394_v37, %v1832_v10  ;;  %v2292_v21 = vpop.eup %2291  ;;  %v1640_v63 = vadd.f32 1e-05, %v1624_v11 }
 0x2b9   :  { %v1767_v57 = vmul.f32 %v2290_v24, %v1766_v40  ;;  %v1773_v3 = vmul.f32 %v2292_v21, %v1639_v44  ;;  %vm1779_vm11 = vweird.f32 %v2292_v21 }
 0x2ba   :  { %1867 = vst [vmem:[#allocation11 + $0x58] sm:$0xff] %v1851_v59  ;;  %2293 = vrsqrt.f32 %v1640_v63  ;;  %vm1780_vm12 = vmor %vm1778_vm10, %vm1779_vm11  ;;  %vm1788_vm14 = vweird.f32 %v1640_v63 }
 0x2bb   :  { %v1771_v23 = vsel %vm1770_vm9, %v2290_v24, %v1767_v57  ;;  %v1774_v27 = vmul.f32 %v2292_v21, %v1773_v3 }
 0x2bc   :  { %v1814_v33 = vmul.f32 %v1771_v23, %v3361_v35 }
 0x2bd   :  { %v1775_v60 = vmul.f32 0.5, %v1774_v27 }
 0x2be   :  { %v1833_v19 = vmul.f32 %v3389_v55, %v1814_v33 }
 0x2bf   :  { %v1776_v31 = vsub.f32 1.5, %v1775_v60  ;;  %v1609_v62 = vpop.xlane.xlu0 %1608 }
 0x2c0   :  { %v1852_v26 = vadd.f32 %v3394_v37, %v1833_v19  ;;  %v1625_v56 = vmul.f32 %v1609_v62, %v3546_v36  ;;  %v2294_v49 = vpop.eup %2293 }
 0x2c1   :  { %v1777_v38 = vmul.f32 %v2292_v21, %v1776_v31  ;;  %v1783_v18 = vmul.f32 %v2294_v49, %v1640_v63  ;;  %vm1789_vm13 = vweird.f32 %v2294_v49 }
 0x2c2   :  { %1868 = vst [vmem:[#allocation11 + $0x60] sm:$0xff] %v1852_v26  ;;  %v1641_v28 = vadd.f32 1e-05, %v1625_v56  ;;  %vm1790_vm15 = vmor %vm1788_vm14, %vm1789_vm13 }
 0x2c3   :  { %v1781_v29 = vsel %vm1780_vm12, %v2292_v21, %v1777_v38  ;;  %v1784_v53 = vmul.f32 %v2294_v49, %v1783_v18 }
 0x2c4   :  { %v1815_v35 = vmul.f32 %v1781_v29, %v3367_v8  ;;  %2295 = vrsqrt.f32 %v1641_v28  ;;  %vm1798_vm1 = vweird.f32 %v1641_v28 }
 0x2c5   :  { %v1785_v6 = vmul.f32 0.5, %v1784_v53 }
 0x2c6   :  { %v1834_v52 = vmul.f32 %v3389_v55, %v1815_v35 }
 0x2c7   :  { %v1786_v47 = vsub.f32 1.5, %v1785_v6 }
 0x2c8   :  { %v1853_v13 = vadd.f32 %v3394_v37, %v1834_v52 }
 0x2c9   :  { %v1787_v36 = vmul.f32 %v2294_v49, %v1786_v47 }
 0x2ca   :  { %1869 = vst [vmem:[#allocation11 + $0x68] sm:$0xff] %v1853_v13  ;;  %v2296_v32 = vpop.eup %2295 }
 0x2cb   :  { %v1793_v16 = vmul.f32 %v2296_v32, %v1641_v28  ;;  %v1791_v12 = vsel %vm1790_vm15, %v2294_v49, %v1787_v36  ;;  %vm1799_vm0 = vweird.f32 %v2296_v32 }
 0x2cc   :  { %v1816_v8 = vmul.f32 %v1791_v12, %v3374_v61  ;;  %vm1800_vm2 = vmor %vm1798_vm1, %vm1799_vm0 }
 0x2cd   :  { %v1794_v15 = vmul.f32 %v2296_v32, %v1793_v16 }
 0x2ce   :  { %v1835_v5 = vmul.f32 %v3389_v55, %v1816_v8 }
 0x2cf   :  { %v1795_v2 = vmul.f32 0.5, %v1794_v15 }
 0x2d0   :  { %v1854_v14 = vadd.f32 %v3394_v37, %v1835_v5 }
 0x2d1   :  { %v1796_v54 = vsub.f32 1.5, %v1795_v2 }
 0x2d2   :  { %1870 = vst [vmem:[#allocation11 + $0x70] sm:$0xff] %v1854_v14 }
 0x2d3   :  { %v1797_v20 = vmul.f32 %v2296_v32, %v1796_v54 }
 0x2d5   :  { %v1801_v50 = vsel %vm1800_vm2, %v2296_v32, %v1797_v20 }
 0x2d6   :  { %v1817_v58 = vmul.f32 %v1801_v50, %v3381_v34 }
 0x2d8   :  { %v1836_v61 = vmul.f32 %v3389_v55, %v1817_v58 }
 0x2da   :  { %v1855_v7 = vadd.f32 %v3394_v37, %v1836_v61 }
 0x2dc   :  { %1871 = vst [vmem:[#allocation11 + $0x78] sm:$0xff] %v1855_v7 }
 0x2dd   :  { %1884 = dma.vmem_to_hbm [thread:$0]  %s1877_s8, 2048, %s1879_s1, [#allocation4], %s2452_s26, %s2452_s26, %s2453_s4  }
 0x2de   :  { %2447 = dma.done.wait [#allocation4], 2048  }
 0x2df   :  { %2448 = vsyncadd [#allocation4], 4294965248 }
 0x2e0   :  { %1889 = vsyncpa [#allocation3], 1 }
 0x2e1   :  { %1890 = vsyncpa [#allocation6], 1 }
 0x2e2   :  { %1891 = vsyncpa [#allocation9], 1 }
 0x2e3   :  { %1892 = vsyncpa [#allocation4], 1 }

</bundles_post_ra>
